<compile_context>
chip_gen: v7x
topology: tpu7x:2x2x1
jax: 0.10.0
libtpu: 0.0.40
codegen_flags: <defaults>
</compile_context>

<pallas_src>
import numpy as np
import jax
import jax.numpy as jnp
from jax import lax
from jax.experimental import pallas as pl
from jax.experimental.pallas import tpu as pltpu


def _roll_right(a, s):
    """Static circular right-rotation along the lane axis: result[:, d] = a[:, (d-s) % D]."""
    d = a.shape[-1]
    if s == 0:
        return a
    return jnp.concatenate([a[:, d - s:], a[:, :d - s]], axis=-1)


def cbp_kernel(x1_ref, x2_ref, s1t_ref, s2t_ref, o_ref):
    """One grid step == one block of `bt` batch elements.

    x1_ref : (bt, C1, HW)  activations, native NCHW layout (H*W flattened)
    x2_ref : (bt, C2, HW)
    s1t_ref: (D, C1)       transposed dense count-sketch matrix 1
    s2t_ref: (D, C2)       transposed dense count-sketch matrix 2
    o_ref  : (bt, D)       sum-pooled compact bilinear features
    """
    bt = x1_ref.shape[0]
    D = s1t_ref.shape[0]

    # Hoisted out of the batch loop (JAX does not CSE broadcasts/loads).
    s1t = s1t_ref[...]                                        # (D, C1)
    s2t = s2t_ref[...]                                        # (D, C2)
    row_idx = lax.broadcasted_iota(jnp.int32, (D, D), 0)      # row index plane for the skew

    rows = []
    for b in range(bt):                                       # bt is small & static
        x1 = x1_ref[b]                                        # (C1, HW)
        x2 = x2_ref[b]                                        # (C2, HW)

        # Count-sketch projections in the native layout: (D, HW).  MXU.
        sk1 = jnp.dot(s1t, x1, preferred_element_type=jnp.float32)
        sk2 = jnp.dot(s2t, x2, preferred_element_type=jnp.float32)

        # Gram matrix contracting over the H*W pixels (this *is* the sum_pool):
        #   G[k, j] = sum_n sk1[k, n] * sk2[j, n]              (D, D), MXU.
        G = lax.dot_general(sk1, sk2, (((1,), (1,)), ((), ())),
                            preferred_element_type=jnp.float32)

        # Circular conv + sum_pool  ==  circular anti-diagonal sums of G:
        #   out[d] = sum_k G[k, (d - k) mod D]
        # Skew the matrix so row k is rotated right by k, using a bit-decomposition of k:
        # log2(D) whole-matrix static rotations + per-row selects, then one column sum.
        A = G
        s = 1
        while s < D:
            A = jnp.where((row_idx & s) != 0, _roll_right(A, s), A)
            s *= 2
        rows.append(jnp.sum(A, axis=0, keepdims=True))        # (1, D)

    # Single lane-dense (bt, D) store.
    o_ref[...] = jnp.concatenate(rows, axis=0) if bt > 1 else rows[0]


def compact_bilinear_pooling(bottom1, bottom2, S1, S2):
    """bottom1: (B, C1, H, W), bottom2: (B, C2, H, W)  ->  (B, D).  (sum_pool=True path)"""
    B, C1, H, W = bottom1.shape
    B2, C2, _, _ = bottom2.shape
    assert B == B2
    D = S1.shape[1]
    HW = H * W

    # Native-layout consumption: a pure reshape (no HBM-rewriting transpose of activations).
    x1 = bottom1.reshape(B, C1, HW)
    x2 = bottom2.reshape(B, C2, HW)
    # Pre-transpose the (tiny, constant) sketch matrices instead of the activations.
    s1t = jnp.transpose(S1)                                   # (D, C1)
    s2t = jnp.transpose(S2)                                   # (D, C2)

    # Batch elements per grid step (amortizes per-step pipeline overhead).
    if B <= 8:
        bt = B
    elif B % 8 == 0:
        bt = 8
    else:
        bt = B   # keep block == full batch so the (8,128)/full-dim block rule holds

    out = pl.pallas_call(
        cbp_kernel,
        out_shape=jax.ShapeDtypeStruct((B, D), jnp.float32),
        grid_spec=pltpu.PrefetchScalarGridSpec(
            num_scalar_prefetch=0,
            grid=(B // bt,),
            in_specs=[
                pl.BlockSpec((bt, C1, HW), lambda g: (g, 0, 0)),
                pl.BlockSpec((bt, C2, HW), lambda g: (g, 0, 0)),
                pl.BlockSpec((D, C1), lambda g: (0, 0)),
                pl.BlockSpec((D, C2), lambda g: (0, 0)),
            ],
            out_specs=pl.BlockSpec((bt, D), lambda g: (g, 0)),
        ),
        # Batch blocks are independent: "parallel" lets v7x shard them across its 2 TCs.
        compiler_params=pltpu.CompilerParams(
            dimension_semantics=("parallel",)),
    )(x1, x2, s1t, s2t)
    return out


def make_sketch_matrix(rand_h, rand_s, output_dim):
    """Dense equivalent of the torch sparse sketch matrix: (input_dim, output_dim)."""
    input_dim = len(rand_h)
    S = np.zeros((input_dim, output_dim), dtype=np.float32)
    S[np.arange(input_dim), rand_h.astype(np.int64)] = rand_s.astype(np.float32)
    return jnp.asarray(S)


if __name__ == "__main__":
    # Small shapes consistent with the module's 4-D forward path (D lane-dense at 128).
    B, C1, C2, H, W, D = 2, 6, 4, 8, 8, 128

    key = jax.random.PRNGKey(0)
    k1, k2 = jax.random.split(key)
    bottom1 = jax.random.normal(k1, (B, C1, H, W), dtype=jnp.float32)
    bottom2 = jax.random.normal(k2, (B, C2, H, W), dtype=jnp.float32)

    # Deterministic sketch parameters, exactly as in the module's __init__.
    np.random.seed(1); rand_h_1 = np.random.randint(D, size=C1)
    np.random.seed(3); rand_s_1 = 2 * np.random.randint(2, size=C1) - 1
    np.random.seed(5); rand_h_2 = np.random.randint(D, size=C2)
    np.random.seed(7); rand_s_2 = 2 * np.random.randint(2, size=C2) - 1
    S1 = make_sketch_matrix(rand_h_1, rand_s_1, D)
    S2 = make_sketch_matrix(rand_h_2, rand_s_2, D)

    out = compact_bilinear_pooling(bottom1, bottom2, S1, S2)
    out = jax.block_until_ready(out)

    # High-precision FFT reference mirroring the torch forward (sum_pool=True).
    b1 = np.asarray(bottom1, dtype=np.float64)
    b2 = np.asarray(bottom2, dtype=np.float64)
    x1f = b1.transpose(0, 2, 3, 1).reshape(-1, C1) @ np.asarray(S1, dtype=np.float64)
    x2f = b2.transpose(0, 2, 3, 1).reshape(-1, C2) @ np.asarray(S2, dtype=np.float64)
    ref = np.real(np.fft.ifft(np.fft.fft(x1f) * np.fft.fft(x2f)))
    ref = ref.reshape(B, H, W, D).sum(axis=(1, 2))

    assert out.shape == (B, D)
    assert np.allclose(np.asarray(out), ref, rtol=1e-3, atol=1e-2)
    print("KERNEL_OK")
</pallas_src>

<mosaic_0001>
module attributes {stable_mosaic.version = 11 : i64} {
  func.func @cbp_kernel(%arg0: i32, %arg1: memref<2x6x64xf32, #tpu.memory_space<vmem>>, %arg2: memref<2x4x64xf32, #tpu.memory_space<vmem>>, %arg3: memref<128x6xf32, #tpu.memory_space<vmem>>, %arg4: memref<128x4xf32, #tpu.memory_space<vmem>>, %arg5: memref<2x128xf32, #tpu.memory_space<vmem>>) attributes {dimension_semantics = [#tpu.dimension_semantics<parallel>], iteration_bounds = array<i64: 1>, scalar_prefetch = 0 : i64, scratch_operands = 0 : i64, tpu.core_type = #tpu.core_type<tc>, window_params = [{transform_indices = @transform_0, window_bounds = array<i64: 2, 6, 64>}, {transform_indices = @transform_1, window_bounds = array<i64: 2, 4, 64>}, {pipeline_mode = #tpu.pipeline_mode<synchronous>, transform_indices = @transform_2, window_bounds = array<i64: 128, 6>}, {pipeline_mode = #tpu.pipeline_mode<synchronous>, transform_indices = @transform_3, window_bounds = array<i64: 128, 4>}, {transform_indices = @transform_4, window_bounds = array<i64: 2, 128>}]} {
    %c0 = arith.constant 0 : index
    %c0_0 = arith.constant 0 : index
    %0 = vector.load %arg3[%c0, %c0_0] : memref<128x6xf32, #tpu.memory_space<vmem>>, vector<128x6xf32>
    %c0_1 = arith.constant 0 : index
    %c0_2 = arith.constant 0 : index
    %1 = vector.load %arg4[%c0_1, %c0_2] : memref<128x4xf32, #tpu.memory_space<vmem>>, vector<128x4xf32>
    %2 = tpu.iota {dimensions = array<i32: 0>} : vector<128x128xi32>
    %c0_3 = arith.constant 0 : index
    %c0_4 = arith.constant 0 : index
    %c0_5 = arith.constant 0 : index
    %3 = vector.load %arg1[%c0_3, %c0_4, %c0_5] : memref<2x6x64xf32, #tpu.memory_space<vmem>>, vector<1x6x64xf32>
    %4 = vector.shape_cast %3 : vector<1x6x64xf32> to vector<6x64xf32>
    %c0_6 = arith.constant 0 : index
    %c0_7 = arith.constant 0 : index
    %c0_8 = arith.constant 0 : index
    %5 = vector.load %arg2[%c0_6, %c0_7, %c0_8] : memref<2x4x64xf32, #tpu.memory_space<vmem>>, vector<1x4x64xf32>
    %6 = vector.shape_cast %5 : vector<1x4x64xf32> to vector<4x64xf32>
    %cst = arith.constant dense<0.000000e+00> : vector<128x64xf32>
    %7 = tpu.matmul %0, %4, %cst {dimension_numbers = #tpu.dot_dimension_numbers<[1], [0], [0], [1], [0, 0, 1, 1], [], []>} : vector<128x6xf32>, vector<6x64xf32>, vector<128x64xf32> -> vector<128x64xf32>
    %cst_9 = arith.constant dense<0.000000e+00> : vector<128x64xf32>
    %8 = tpu.matmul %1, %6, %cst_9 {dimension_numbers = #tpu.dot_dimension_numbers<[1], [0], [0], [1], [0, 0, 1, 1], [], []>} : vector<128x4xf32>, vector<4x64xf32>, vector<128x64xf32> -> vector<128x64xf32>
    %cst_10 = arith.constant dense<0.000000e+00> : vector<128x128xf32>
    %9 = tpu.matmul %7, %8, %cst_10 {dimension_numbers = #tpu.dot_dimension_numbers<[1], [1], [0], [0], [0, 0, 1, 0], [], []>} : vector<128x64xf32>, vector<128x64xf32>, vector<128x128xf32> -> vector<128x128xf32>
    %c1_i32 = arith.constant 1 : i32
    %10 = vector.broadcast %c1_i32 : i32 to vector<128x128xi32>
    %11 = arith.andi %2, %10 : vector<128x128xi32>
    %c0_i32 = arith.constant 0 : i32
    %12 = vector.broadcast %c0_i32 : i32 to vector<128x128xi32>
    %13 = arith.cmpi ne, %11, %12 : vector<128x128xi32>
    %14 = vector.extract_strided_slice %9 {offsets = [0, 127], sizes = [128, 1], strides = [1, 1]} : vector<128x128xf32> to vector<128x1xf32>
    %15 = vector.extract_strided_slice %9 {offsets = [0, 0], sizes = [128, 127], strides = [1, 1]} : vector<128x128xf32> to vector<128x127xf32>
    %16 = tpu.concatenate %14, %15 in 1 : vector<128x1xf32>, vector<128x127xf32> -> vector<128x128xf32>
    %17 = arith.select %13, %16, %9 : vector<128x128xi1>, vector<128x128xf32>
    %c2_i32 = arith.constant 2 : i32
    %18 = vector.broadcast %c2_i32 : i32 to vector<128x128xi32>
    %19 = arith.andi %2, %18 : vector<128x128xi32>
    %c0_i32_11 = arith.constant 0 : i32
    %20 = vector.broadcast %c0_i32_11 : i32 to vector<128x128xi32>
    %21 = arith.cmpi ne, %19, %20 : vector<128x128xi32>
    %22 = vector.extract_strided_slice %17 {offsets = [0, 126], sizes = [128, 2], strides = [1, 1]} : vector<128x128xf32> to vector<128x2xf32>
    %23 = vector.extract_strided_slice %17 {offsets = [0, 0], sizes = [128, 126], strides = [1, 1]} : vector<128x128xf32> to vector<128x126xf32>
    %24 = tpu.concatenate %22, %23 in 1 : vector<128x2xf32>, vector<128x126xf32> -> vector<128x128xf32>
    %25 = arith.select %21, %24, %17 : vector<128x128xi1>, vector<128x128xf32>
    %c4_i32 = arith.constant 4 : i32
    %26 = vector.broadcast %c4_i32 : i32 to vector<128x128xi32>
    %27 = arith.andi %2, %26 : vector<128x128xi32>
    %c0_i32_12 = arith.constant 0 : i32
    %28 = vector.broadcast %c0_i32_12 : i32 to vector<128x128xi32>
    %29 = arith.cmpi ne, %27, %28 : vector<128x128xi32>
    %30 = vector.extract_strided_slice %25 {offsets = [0, 124], sizes = [128, 4], strides = [1, 1]} : vector<128x128xf32> to vector<128x4xf32>
    %31 = vector.extract_strided_slice %25 {offsets = [0, 0], sizes = [128, 124], strides = [1, 1]} : vector<128x128xf32> to vector<128x124xf32>
    %32 = tpu.concatenate %30, %31 in 1 : vector<128x4xf32>, vector<128x124xf32> -> vector<128x128xf32>
    %33 = arith.select %29, %32, %25 : vector<128x128xi1>, vector<128x128xf32>
    %c8_i32 = arith.constant 8 : i32
    %34 = vector.broadcast %c8_i32 : i32 to vector<128x128xi32>
    %35 = arith.andi %2, %34 : vector<128x128xi32>
    %c0_i32_13 = arith.constant 0 : i32
    %36 = vector.broadcast %c0_i32_13 : i32 to vector<128x128xi32>
    %37 = arith.cmpi ne, %35, %36 : vector<128x128xi32>
    %38 = vector.extract_strided_slice %33 {offsets = [0, 120], sizes = [128, 8], strides = [1, 1]} : vector<128x128xf32> to vector<128x8xf32>
    %39 = vector.extract_strided_slice %33 {offsets = [0, 0], sizes = [128, 120], strides = [1, 1]} : vector<128x128xf32> to vector<128x120xf32>
    %40 = tpu.concatenate %38, %39 in 1 : vector<128x8xf32>, vector<128x120xf32> -> vector<128x128xf32>
    %41 = arith.select %37, %40, %33 : vector<128x128xi1>, vector<128x128xf32>
    %c16_i32 = arith.constant 16 : i32
    %42 = vector.broadcast %c16_i32 : i32 to vector<128x128xi32>
    %43 = arith.andi %2, %42 : vector<128x128xi32>
    %c0_i32_14 = arith.constant 0 : i32
    %44 = vector.broadcast %c0_i32_14 : i32 to vector<128x128xi32>
    %45 = arith.cmpi ne, %43, %44 : vector<128x128xi32>
    %46 = vector.extract_strided_slice %41 {offsets = [0, 112], sizes = [128, 16], strides = [1, 1]} : vector<128x128xf32> to vector<128x16xf32>
    %47 = vector.extract_strided_slice %41 {offsets = [0, 0], sizes = [128, 112], strides = [1, 1]} : vector<128x128xf32> to vector<128x112xf32>
    %48 = tpu.concatenate %46, %47 in 1 : vector<128x16xf32>, vector<128x112xf32> -> vector<128x128xf32>
    %49 = arith.select %45, %48, %41 : vector<128x128xi1>, vector<128x128xf32>
    %c32_i32 = arith.constant 32 : i32
    %50 = vector.broadcast %c32_i32 : i32 to vector<128x128xi32>
    %51 = arith.andi %2, %50 : vector<128x128xi32>
    %c0_i32_15 = arith.constant 0 : i32
    %52 = vector.broadcast %c0_i32_15 : i32 to vector<128x128xi32>
    %53 = arith.cmpi ne, %51, %52 : vector<128x128xi32>
    %54 = vector.extract_strided_slice %49 {offsets = [0, 96], sizes = [128, 32], strides = [1, 1]} : vector<128x128xf32> to vector<128x32xf32>
    %55 = vector.extract_strided_slice %49 {offsets = [0, 0], sizes = [128, 96], strides = [1, 1]} : vector<128x128xf32> to vector<128x96xf32>
    %56 = tpu.concatenate %54, %55 in 1 : vector<128x32xf32>, vector<128x96xf32> -> vector<128x128xf32>
    %57 = arith.select %53, %56, %49 : vector<128x128xi1>, vector<128x128xf32>
    %c64_i32 = arith.constant 64 : i32
    %58 = vector.broadcast %c64_i32 : i32 to vector<128x128xi32>
    %59 = arith.andi %2, %58 : vector<128x128xi32>
    %c0_i32_16 = arith.constant 0 : i32
    %60 = vector.broadcast %c0_i32_16 : i32 to vector<128x128xi32>
    %61 = arith.cmpi ne, %59, %60 : vector<128x128xi32>
    %62 = vector.extract_strided_slice %57 {offsets = [0, 64], sizes = [128, 64], strides = [1, 1]} : vector<128x128xf32> to vector<128x64xf32>
    %63 = vector.extract_strided_slice %57 {offsets = [0, 0], sizes = [128, 64], strides = [1, 1]} : vector<128x128xf32> to vector<128x64xf32>
    %64 = tpu.concatenate %62, %63 in 1 : vector<128x64xf32>, vector<128x64xf32> -> vector<128x128xf32>
    %65 = arith.select %61, %64, %57 : vector<128x128xi1>, vector<128x128xf32>
    %cst_17 = arith.constant dense<0.000000e+00> : vector<128xf32>
    %66 = vector.multi_reduction <add>, %65, %cst_17 [0] : vector<128x128xf32> to vector<128xf32>
    %67 = vector.shape_cast %66 : vector<128xf32> to vector<1x128xf32>
    %c1 = arith.constant 1 : index
    %c0_18 = arith.constant 0 : index
    %c0_19 = arith.constant 0 : index
    %68 = vector.load %arg1[%c1, %c0_18, %c0_19] : memref<2x6x64xf32, #tpu.memory_space<vmem>>, vector<1x6x64xf32>
    %69 = vector.shape_cast %68 : vector<1x6x64xf32> to vector<6x64xf32>
    %c1_20 = arith.constant 1 : index
    %c0_21 = arith.constant 0 : index
    %c0_22 = arith.constant 0 : index
    %70 = vector.load %arg2[%c1_20, %c0_21, %c0_22] : memref<2x4x64xf32, #tpu.memory_space<vmem>>, vector<1x4x64xf32>
    %71 = vector.shape_cast %70 : vector<1x4x64xf32> to vector<4x64xf32>
    %cst_23 = arith.constant dense<0.000000e+00> : vector<128x64xf32>
    %72 = tpu.matmul %0, %69, %cst_23 {dimension_numbers = #tpu.dot_dimension_numbers<[1], [0], [0], [1], [0, 0, 1, 1], [], []>} : vector<128x6xf32>, vector<6x64xf32>, vector<128x64xf32> -> vector<128x64xf32>
    %cst_24 = arith.constant dense<0.000000e+00> : vector<128x64xf32>
    %73 = tpu.matmul %1, %71, %cst_24 {dimension_numbers = #tpu.dot_dimension_numbers<[1], [0], [0], [1], [0, 0, 1, 1], [], []>} : vector<128x4xf32>, vector<4x64xf32>, vector<128x64xf32> -> vector<128x64xf32>
    %cst_25 = arith.constant dense<0.000000e+00> : vector<128x128xf32>
    %74 = tpu.matmul %72, %73, %cst_25 {dimension_numbers = #tpu.dot_dimension_numbers<[1], [1], [0], [0], [0, 0, 1, 0], [], []>} : vector<128x64xf32>, vector<128x64xf32>, vector<128x128xf32> -> vector<128x128xf32>
    %c1_i32_26 = arith.constant 1 : i32
    %75 = vector.broadcast %c1_i32_26 : i32 to vector<128x128xi32>
    %76 = arith.andi %2, %75 : vector<128x128xi32>
    %c0_i32_27 = arith.constant 0 : i32
    %77 = vector.broadcast %c0_i32_27 : i32 to vector<128x128xi32>
    %78 = arith.cmpi ne, %76, %77 : vector<128x128xi32>
    %79 = vector.extract_strided_slice %74 {offsets = [0, 127], sizes = [128, 1], strides = [1, 1]} : vector<128x128xf32> to vector<128x1xf32>
    %80 = vector.extract_strided_slice %74 {offsets = [0, 0], sizes = [128, 127], strides = [1, 1]} : vector<128x128xf32> to vector<128x127xf32>
    %81 = tpu.concatenate %79, %80 in 1 : vector<128x1xf32>, vector<128x127xf32> -> vector<128x128xf32>
    %82 = arith.select %78, %81, %74 : vector<128x128xi1>, vector<128x128xf32>
    %c2_i32_28 = arith.constant 2 : i32
    %83 = vector.broadcast %c2_i32_28 : i32 to vector<128x128xi32>
    %84 = arith.andi %2, %83 : vector<128x128xi32>
    %c0_i32_29 = arith.constant 0 : i32
    %85 = vector.broadcast %c0_i32_29 : i32 to vector<128x128xi32>
    %86 = arith.cmpi ne, %84, %85 : vector<128x128xi32>
    %87 = vector.extract_strided_slice %82 {offsets = [0, 126], sizes = [128, 2], strides = [1, 1]} : vector<128x128xf32> to vector<128x2xf32>
    %88 = vector.extract_strided_slice %82 {offsets = [0, 0], sizes = [128, 126], strides = [1, 1]} : vector<128x128xf32> to vector<128x126xf32>
    %89 = tpu.concatenate %87, %88 in 1 : vector<128x2xf32>, vector<128x126xf32> -> vector<128x128xf32>
    %90 = arith.select %86, %89, %82 : vector<128x128xi1>, vector<128x128xf32>
    %c4_i32_30 = arith.constant 4 : i32
    %91 = vector.broadcast %c4_i32_30 : i32 to vector<128x128xi32>
    %92 = arith.andi %2, %91 : vector<128x128xi32>
    %c0_i32_31 = arith.constant 0 : i32
    %93 = vector.broadcast %c0_i32_31 : i32 to vector<128x128xi32>
    %94 = arith.cmpi ne, %92, %93 : vector<128x128xi32>
    %95 = vector.extract_strided_slice %90 {offsets = [0, 124], sizes = [128, 4], strides = [1, 1]} : vector<128x128xf32> to vector<128x4xf32>
    %96 = vector.extract_strided_slice %90 {offsets = [0, 0], sizes = [128, 124], strides = [1, 1]} : vector<128x128xf32> to vector<128x124xf32>
    %97 = tpu.concatenate %95, %96 in 1 : vector<128x4xf32>, vector<128x124xf32> -> vector<128x128xf32>
    %98 = arith.select %94, %97, %90 : vector<128x128xi1>, vector<128x128xf32>
    %c8_i32_32 = arith.constant 8 : i32
    %99 = vector.broadcast %c8_i32_32 : i32 to vector<128x128xi32>
    %100 = arith.andi %2, %99 : vector<128x128xi32>
    %c0_i32_33 = arith.constant 0 : i32
    %101 = vector.broadcast %c0_i32_33 : i32 to vector<128x128xi32>
    %102 = arith.cmpi ne, %100, %101 : vector<128x128xi32>
    %103 = vector.extract_strided_slice %98 {offsets = [0, 120], sizes = [128, 8], strides = [1, 1]} : vector<128x128xf32> to vector<128x8xf32>
    %104 = vector.extract_strided_slice %98 {offsets = [0, 0], sizes = [128, 120], strides = [1, 1]} : vector<128x128xf32> to vector<128x120xf32>
    %105 = tpu.concatenate %103, %104 in 1 : vector<128x8xf32>, vector<128x120xf32> -> vector<128x128xf32>
    %106 = arith.select %102, %105, %98 : vector<128x128xi1>, vector<128x128xf32>
    %c16_i32_34 = arith.constant 16 : i32
    %107 = vector.broadcast %c16_i32_34 : i32 to vector<128x128xi32>
    %108 = arith.andi %2, %107 : vector<128x128xi32>
    %c0_i32_35 = arith.constant 0 : i32
    %109 = vector.broadcast %c0_i32_35 : i32 to vector<128x128xi32>
    %110 = arith.cmpi ne, %108, %109 : vector<128x128xi32>
    %111 = vector.extract_strided_slice %106 {offsets = [0, 112], sizes = [128, 16], strides = [1, 1]} : vector<128x128xf32> to vector<128x16xf32>
    %112 = vector.extract_strided_slice %106 {offsets = [0, 0], sizes = [128, 112], strides = [1, 1]} : vector<128x128xf32> to vector<128x112xf32>
    %113 = tpu.concatenate %111, %112 in 1 : vector<128x16xf32>, vector<128x112xf32> -> vector<128x128xf32>
    %114 = arith.select %110, %113, %106 : vector<128x128xi1>, vector<128x128xf32>
    %c32_i32_36 = arith.constant 32 : i32
    %115 = vector.broadcast %c32_i32_36 : i32 to vector<128x128xi32>
    %116 = arith.andi %2, %115 : vector<128x128xi32>
    %c0_i32_37 = arith.constant 0 : i32
    %117 = vector.broadcast %c0_i32_37 : i32 to vector<128x128xi32>
    %118 = arith.cmpi ne, %116, %117 : vector<128x128xi32>
    %119 = vector.extract_strided_slice %114 {offsets = [0, 96], sizes = [128, 32], strides = [1, 1]} : vector<128x128xf32> to vector<128x32xf32>
    %120 = vector.extract_strided_slice %114 {offsets = [0, 0], sizes = [128, 96], strides = [1, 1]} : vector<128x128xf32> to vector<128x96xf32>
    %121 = tpu.concatenate %119, %120 in 1 : vector<128x32xf32>, vector<128x96xf32> -> vector<128x128xf32>
    %122 = arith.select %118, %121, %114 : vector<128x128xi1>, vector<128x128xf32>
    %c64_i32_38 = arith.constant 64 : i32
    %123 = vector.broadcast %c64_i32_38 : i32 to vector<128x128xi32>
    %124 = arith.andi %2, %123 : vector<128x128xi32>
    %c0_i32_39 = arith.constant 0 : i32
    %125 = vector.broadcast %c0_i32_39 : i32 to vector<128x128xi32>
    %126 = arith.cmpi ne, %124, %125 : vector<128x128xi32>
    %127 = vector.extract_strided_slice %122 {offsets = [0, 64], sizes = [128, 64], strides = [1, 1]} : vector<128x128xf32> to vector<128x64xf32>
    %128 = vector.extract_strided_slice %122 {offsets = [0, 0], sizes = [128, 64], strides = [1, 1]} : vector<128x128xf32> to vector<128x64xf32>
    %129 = tpu.concatenate %127, %128 in 1 : vector<128x64xf32>, vector<128x64xf32> -> vector<128x128xf32>
    %130 = arith.select %126, %129, %122 : vector<128x128xi1>, vector<128x128xf32>
    %cst_40 = arith.constant dense<0.000000e+00> : vector<128xf32>
    %131 = vector.multi_reduction <add>, %130, %cst_40 [0] : vector<128x128xf32> to vector<128xf32>
    %132 = vector.shape_cast %131 : vector<128xf32> to vector<1x128xf32>
    %133 = tpu.concatenate %67, %132 in 0 : vector<1x128xf32>, vector<1x128xf32> -> vector<2x128xf32>
    %c0_41 = arith.constant 0 : index
    %c0_42 = arith.constant 0 : index
    %134 = vector.load %arg5[%c0_41, %c0_42] : memref<2x128xf32, #tpu.memory_space<vmem>>, vector<2x128xf32>
    tpu.vector_store %arg5[%c0_41, %c0_42], %133 {strides = array<i32>} : memref<2x128xf32, #tpu.memory_space<vmem>>, vector<2x128xf32>,
    return
  }
  func.func @transform_0(%arg0: i32) -> (i32, i32, i32) {
    %c0_i32 = arith.constant 0 : i32
    %c0_i32_0 = arith.constant 0 : i32
    %c0_i32_1 = arith.constant 0 : i32
    return %arg0, %c0_i32, %c0_i32_0 : i32, i32, i32
  }
  func.func @transform_1(%arg0: i32) -> (i32, i32, i32) {
    %c0_i32 = arith.constant 0 : i32
    %c0_i32_0 = arith.constant 0 : i32
    %c0_i32_1 = arith.constant 0 : i32
    return %arg0, %c0_i32, %c0_i32_0 : i32, i32, i32
  }
  func.func @transform_2(%arg0: i32) -> (i32, i32) {
    %c0_i32 = arith.constant 0 : i32
    %c0_i32_0 = arith.constant 0 : i32
    %c0_i32_1 = arith.constant 0 : i32
    return %c0_i32, %c0_i32_0 : i32, i32
  }
  func.func @transform_3(%arg0: i32) -> (i32, i32) {
    %c0_i32 = arith.constant 0 : i32
    %c0_i32_0 = arith.constant 0 : i32
    %c0_i32_1 = arith.constant 0 : i32
    return %c0_i32, %c0_i32_0 : i32, i32
  }
  func.func @transform_4(%arg0: i32) -> (i32, i32) {
    %c0_i32 = arith.constant 0 : i32
    %c0_i32_0 = arith.constant 0 : i32
    return %arg0, %c0_i32 : i32, i32
  }
}

</mosaic_0001>

<bundles_post_ra>
// kernel: tpu_custom_call.1
= control target key start
LH: loop header
LB: loop body
LE: loop exit
PB: predicated region body
PF: predicated region fallthrough
CT: control target
= control target key end

     0   :  { %vm316_vm0 = vcmask 1043456   ;;  %vm267_vm1 = vcmask 31744   ;;  %vm118_vm2 = vcmask 1045504   ;;  %vm69_vm3 = vcmask 48128   ;;  %s4688_s0 = inlined_call_operand.vmem [shape: f32[2,6,64], index: 0, kind: input, shape index: {}]   ;;  %s4689_s1 = inlined_call_operand.vmem [shape: f32[2,4,64], index: 1, kind: input, shape index: {}]   ;;  %s4690_s2 = inlined_call_operand.vmem [shape: f32[128,6], index: 2, kind: input, shape index: {}]   ;;  %s4691_s3 = inlined_call_operand.vmem [shape: f32[128,4], index: 3, kind: input, shape index: {}]   ;;  %s4692_s4 = inlined_call_operand.hbm [shape: f32[2,128], index: 4, kind: output, shape index: {}]  }
   0x1   :  { %v68_v0 = vld [vmem:[%s4689_s1] sm:$0xf]  ;;  %v3321_v2 = vld [vmem:[%s4691_s3 + $0x8] sm:$0xff]  ;;  %v3332_v4 = vld [vmem:[%s4691_s3 + $0x10] sm:$0xff] }
   0x2   :  { %v3316_v1 = vld [vmem:[%s4691_s3] sm:$0xff]  ;;  %2943 = vmatprep.subr.msk.mxu1 %vm316_vm0, %v68_v0  ;;  %v2717_v3 = vld [vmem:[%s4688_s0 + $0x8] sm:$0x3f]  ;;  %v3344_v5 = vld [vmem:[%s4691_s3 + $0x18] sm:$0xff] }
   0x3   :  { %2945 = vmatprep.mubr.msk.f32.mxu1 %vm267_vm1, %v3316_v1  ;;  %2944 = vmatpush3.msk.msra.mxu1 %vm316_vm0, %v68_v0  ;;  %v3349_v6 = vld [vmem:[%s4691_s3 + $0x20] sm:$0xff]  ;;  %v3365_v9 = vld [vmem:[%s4691_s3 + $0x28] sm:$0xff]  ;;  %v3371_v10 = vld [vmem:[%s4691_s3 + $0x30] sm:$0xff] }
   0x4   :  { %2946 = vmatmul.mubr.msk.f32.vlgmr.msra.gmra.mrb[0].mxu1 %vm267_vm1, %v3321_v2  ;;  %3025 = vmatprep.subr.msk.mxu1 %vm118_vm2, %v2717_v3  ;;  %v2718_v7 = vld [vmem:[%s4689_s1 + $0x4] sm:$0xf]  ;;  %v3383_v12 = vld [vmem:[%s4691_s3 + $0x38] sm:$0xff] }
   0x5   :  { %3026 = vmatpush3.msk.msra.mxu1 %vm118_vm2, %v2717_v3  ;;  %2948 = vmatprep.mubr.msk.f32.mxu1 %vm267_vm1, %v3332_v4  ;;  %v18_v8 = vld [vmem:[%s4690_s2] sm:$0xff] }
   0x6   :  { %3051 = vmatprep.subr.msk.mxu1 %vm316_vm0, %v2718_v7  ;;  %2919 = vmatprep.mubr.msk.f32.mxu0 %vm69_vm3, %v18_v8  ;;  %v67_v11 = vld [vmem:[%s4688_s0] sm:$0x3f] }
   0x7   :  { %2917 = vmatprep.subr.msk.mxu0 %vm118_vm2, %v67_v11 }
   0x8   :  { %2949 = vmatmul.mubr.msk.f32.gmra.mrb[2].mxu1 %vm267_vm1, %v3344_v5 }
   0x9   :  { %2951 = vmatprep.mubr.msk.f32.mxu1 %vm267_vm1, %v3349_v6 }
   0xc   :  { %2952 = vmatmul.mubr.msk.f32.gmra.mrb[4].mxu1 %vm267_vm1, %v3365_v9 }
   0xd   :  { %2954 = vmatprep.mubr.msk.f32.mxu1 %vm267_vm1, %v3371_v10 }
   0xe   :  { %9 = vsyncpa [#allocation3], 0  ;;  %v3389_v13 = vld [vmem:[%s4691_s3 + $0x40] sm:$0xff]  ;;  %v19_v14 = vld [vmem:[%s4690_s2 + $0x8] sm:$0xff]  ;;  %2918 = vmatpush3.msk.msra.mxu0 %vm118_vm2, %v67_v11  ;;  %vm465_vm4 = vcmask 523264   ;;  %s3278_s30 = smov 2  }
   0xf   :  { %v20_v15 = vld [vmem:[%s4690_s2 + $0x10] sm:$0xff]  ;;  %2920 = vmatmul.mubr.msk.f32.vlgmr.msra.gmra.mrb[0].mxu0 %vm69_vm3, %v19_v14  ;;  %v3407_v16 = vld [vmem:[%s4691_s3 + $0x48] sm:$0xff]  ;;  %v21_v18 = vld [vmem:[%s4690_s2 + $0x18] sm:$0xff]  ;;  %s3279_s5 = smov 4   ;;  %s3280_s6 = smov 8  }
  0x10   :  { %2955 = vmatmul.mubr.msk.f32.gmra.mrb[6].mxu1 %vm267_vm1, %v3383_v12  ;;  %2922 = vmatprep.mubr.msk.f32.mxu0 %vm69_vm3, %v20_v15  ;;  %v3412_v17 = vld [vmem:[%s4691_s3 + $0x50] sm:$0xff]  ;;  %v22_v19 = vld [vmem:[%s4690_s2 + $0x20] sm:$0xff]  ;;  %v45_v20 = vld [vmem:[%s4691_s3 + $0x58] sm:$0xff]  ;;  %s3281_s7 = smov 16   ;;  %s3282_s8 = smov 32  }
  0x11   :  { %2957 = vmatprep.mubr.msk.f32.mxu1 %vm267_vm1, %v3389_v13  ;;  %v46_v21 = vld [vmem:[%s4691_s3 + $0x60] sm:$0xff]  ;;  %v23_v22 = vld [vmem:[%s4690_s2 + $0x28] sm:$0xff]  ;;  %v24_v23 = vld [vmem:[%s4690_s2 + $0x30] sm:$0xff]  ;;  %s3283_s1 = smov 64   ;;  %s3284_s9 = smov [#allocation2]  }
  0x12   :  { %v47_v24 = vld [vmem:[%s4691_s3 + $0x68] sm:$0xff]  ;;  %v48_v25 = vld [vmem:[%s4691_s3 + $0x70] sm:$0xff]  ;;  %v25_v26 = vld [vmem:[%s4690_s2 + $0x38] sm:$0xff]  ;;  %s2643_s10 = sshll.u32 %s3284_s9, 4  ;;  %s2644_s10 = int_to_ptr.vmem [resolvable:$true] %s2643_s10 }
  0x13   :  { %2923 = vmatmul.mubr.msk.f32.gmra.mrb[2].mxu0 %vm69_vm3, %v21_v18  ;;  %v26_v27 = vld [vmem:[%s4690_s2 + $0x40] sm:$0xff]  ;;  %v49_v28 = vld [vmem:[%s4691_s3 + $0x78] sm:$0xff]  ;;  %v27_v29 = vld [vmem:[%s4690_s2 + $0x48] sm:$0xff]  ;;  %s3253_s11 = scalar_lea.vmem %s2644_s10, 32  ;;  %p3258_p1 = scmp.lt.s32.totalorder %s2644_s10, %s2644_s10 }
  0x14   :  { %2958 = vmatmul.mubr.msk.f32.gmra.mrb[8].mxu1 %vm267_vm1, %v3407_v16  ;;  %2925 = vmatprep.mubr.msk.f32.mxu0 %vm69_vm3, %v22_v19  ;;  %v28_v30 = vld [vmem:[%s4690_s2 + $0x50] sm:$0xff]  ;;  %v29_v31 = vld [vmem:[%s4690_s2 + $0x58] sm:$0xff]  ;;  %v30_v32 = vld [vmem:[%s4690_s2 + $0x60] sm:$0xff]  ;;  %p3254_p0 = scmp.ne.s32.totalorder %s2644_s10, %s3253_s11  ;;  %p3259_p2 = scmp.lt.s32.totalorder %s3253_s11, %s3253_s11 }
  0x15   :  { %2960 = vmatprep.mubr.msk.f32.mxu1 %vm267_vm1, %v3412_v17  ;;  %v31_v33 = vld [vmem:[%s4690_s2 + $0x68] sm:$0xff]  ;;  %v32_v34 = vld [vmem:[%s4690_s2 + $0x70] sm:$0xff]  ;;  %v33_v35 = vld [vmem:[%s4690_s2 + $0x78] sm:$0xff]  ;;  %s3277_s2 = smov 1  }
  0x16   :  { %vm3536_vm5 = vmpackc.low %vm465_vm4, %vm465_vm4  ;;  %p3260_p3 = por %p3259_p2, %p3258_p1 }
  0x17   :  { %2926 = vmatmul.mubr.msk.f32.gmra.mrb[4].mxu0 %vm69_vm3, %v23_v22 }
  0x18   :  { %2961 = vmatmul.mubr.msk.f32.gmra.mrb[10].mxu1 %vm267_vm1, %v45_v20  ;;  %2928 = vmatprep.mubr.msk.f32.mxu0 %vm69_vm3, %v24_v23  ;;  %p3261_p4 = pnand %p3260_p3, %p3254_p0 }
  0x19   :  { %2963 = vmatprep.mubr.msk.f32.mxu1 %vm267_vm1, %v46_v21 }
  0x1b   :  { %2929 = vmatmul.mubr.msk.f32.gmra.mrb[6].mxu0 %vm69_vm3, %v25_v26 }
  0x1c   :  { %2964 = vmatmul.mubr.msk.f32.gmra.mrb[12].mxu1 %vm267_vm1, %v47_v24  ;;  %2931 = vmatprep.mubr.msk.f32.mxu0 %vm69_vm3, %v26_v27 }
  0x1d   :  { %2966 = vmatprep.mubr.msk.f32.mxu1 %vm267_vm1, %v48_v25 }
  0x1f   :  { %2932 = vmatmul.mubr.msk.f32.gmra.mrb[8].mxu0 %vm69_vm3, %v27_v29 }
  0x20   :  { %2967 = vmatmul.mubr.msk.f32.gmra.mrb[14].mxu1 %vm267_vm1, %v49_v28  ;;  %2934 = vmatprep.mubr.msk.f32.mxu0 %vm69_vm3, %v28_v30 }
  0x21   :  { %3027 = vmatprep.mubr.msk.f32.mxu1 %vm69_vm3, %v18_v8 }
  0x23   :  { %2935 = vmatmul.mubr.msk.f32.gmra.mrb[10].mxu0 %vm69_vm3, %v29_v31 }
  0x24   :  { %3028 = vmatmul.mubr.msk.f32.vlgmr.msra.gmra.mrb[16].mxu1 %vm69_vm3, %v19_v14  ;;  %2937 = vmatprep.mubr.msk.f32.mxu0 %vm69_vm3, %v30_v32 }
  0x25   :  { %3052 = vmatpush3.msk.msra.mxu1 %vm316_vm0, %v2718_v7  ;;  %3030 = vmatprep.mubr.msk.f32.mxu1 %vm69_vm3, %v20_v15 }
  0x27   :  { %2938 = vmatmul.mubr.msk.f32.gmra.mrb[12].mxu0 %vm69_vm3, %v31_v33 }
  0x28   :  { %3031 = vmatmul.mubr.msk.f32.gmra.mrb[18].mxu1 %vm69_vm3, %v21_v18  ;;  %2940 = vmatprep.mubr.msk.f32.mxu0 %vm69_vm3, %v32_v34 }
  0x29   :  { %3033 = vmatprep.mubr.msk.f32.mxu1 %vm69_vm3, %v22_v19 }
  0x2b   :  { %2941 = vmatmul.mubr.msk.f32.gmra.mrb[14].mxu0 %vm69_vm3, %v33_v35 }
  0x2c   :  { %3034 = vmatmul.mubr.msk.f32.gmra.mrb[20].mxu1 %vm69_vm3, %v23_v22 }
  0x2d   :  { %3036 = vmatprep.mubr.msk.f32.mxu1 %vm69_vm3, %v24_v23 }
  0x30   :  { %3037 = vmatmul.mubr.msk.f32.gmra.mrb[22].mxu1 %vm69_vm3, %v25_v26 }
  0x31   :  { %3039 = vmatprep.mubr.msk.f32.mxu1 %vm69_vm3, %v26_v27 }
  0x34   :  { %3040 = vmatmul.mubr.msk.f32.gmra.mrb[24].mxu1 %vm69_vm3, %v27_v29 }
  0x35   :  { %3042 = vmatprep.mubr.msk.f32.mxu1 %vm69_vm3, %v28_v30 }
  0x38   :  { %3043 = vmatmul.mubr.msk.f32.gmra.mrb[26].mxu1 %vm69_vm3, %v29_v31 }
  0x39   :  { %3045 = vmatprep.mubr.msk.f32.mxu1 %vm69_vm3, %v30_v32 }
  0x3c   :  { %3046 = vmatmul.mubr.msk.f32.gmra.mrb[28].mxu1 %vm69_vm3, %v31_v33 }
  0x3d   :  { %3048 = vmatprep.mubr.msk.f32.mxu1 %vm69_vm3, %v32_v34 }
  0x40   :  { %3049 = vmatmul.mubr.msk.f32.gmra.mrb[30].mxu1 %vm69_vm3, %v33_v35 }
  0x41   :  { %3053 = vmatprep.mubr.msk.f32.mxu1 %vm267_vm1, %v3316_v1 }
  0x44   :  { %3054 = vmatmul.mubr.msk.f32.vlgmr.msra.gmra.mrb[32].mxu1 %vm267_vm1, %v3321_v2 }
  0x45   :  { %3056 = vmatprep.mubr.msk.f32.mxu1 %vm267_vm1, %v3332_v4 }
  0x48   :  { %3057 = vmatmul.mubr.msk.f32.gmra.mrb[34].mxu1 %vm267_vm1, %v3344_v5 }
  0x49   :  { %3059 = vmatprep.mubr.msk.f32.mxu1 %vm267_vm1, %v3349_v6 }
  0x4c   :  { %3060 = vmatmul.mubr.msk.f32.gmra.mrb[36].mxu1 %vm267_vm1, %v3365_v9 }
  0x4d   :  { %3062 = vmatprep.mubr.msk.f32.mxu1 %vm267_vm1, %v3371_v10 }
  0x50   :  { %3063 = vmatmul.mubr.msk.f32.gmra.mrb[38].mxu1 %vm267_vm1, %v3383_v12 }
  0x51   :  { %3065 = vmatprep.mubr.msk.f32.mxu1 %vm267_vm1, %v3389_v13 }
  0x54   :  { %3066 = vmatmul.mubr.msk.f32.gmra.mrb[40].mxu1 %vm267_vm1, %v3407_v16 }
  0x55   :  { %3068 = vmatprep.mubr.msk.f32.mxu1 %vm267_vm1, %v3412_v17 }
  0x58   :  { %3069 = vmatmul.mubr.msk.f32.gmra.mrb[42].mxu1 %vm267_vm1, %v45_v20 }
  0x59   :  { %3071 = vmatprep.mubr.msk.f32.mxu1 %vm267_vm1, %v46_v21 }
  0x5c   :  { %3072 = vmatmul.mubr.msk.f32.gmra.mrb[44].mxu1 %vm267_vm1, %v47_v24 }
  0x5d   :  { %3074 = vmatprep.mubr.msk.f32.mxu1 %vm267_vm1, %v48_v25 }
  0x60   :  { %3075 = vmatmul.mubr.msk.f32.gmra.mrb[46].mxu1 %vm267_vm1, %v49_v28 }
  0xd7   :  { %v2947_v36 = vpop.f32.mrb[0].mxu1 }
  0xd8   :  { %v386_v37 = vpop.f32.mrb[1].mxu1 }
  0xd9   :  { %v3133_v39 = vpack.c.bf16 %v2947_v36, %v386_v37 }
  0xdb   :  { %v2950_v40 = vpop.f32.mrb[2].mxu1  ;;  %3135 = vmatprep.subr.msk.bf16.mxu0 %vm3536_vm5, %v3133_v39 }
  0xdc   :  { %v396_v41 = vpop.f32.mrb[3].mxu1  ;;  %3138 = vmatpush3.bf16.xpose.msk.msra.mxu0 %vm3536_vm5, %v3133_v39 }
  0xdd   :  { %v3139_v42 = vpack.c.bf16 %v2950_v40, %v396_v41 }
  0xdf   :  { %v2953_v43 = vpop.f32.mrb[4].mxu1  ;;  %3141 = vmatprep.subr.msk.bf16.mxu0 %vm3536_vm5, %v3139_v42 }
  0xe0   :  { %v406_v44 = vpop.f32.mrb[5].mxu1 }
  0xe1   :  { %v3145_v45 = vpack.c.bf16 %v2953_v43, %v406_v44 }
  0xe2   :  { %v3546_v46 = vpop.f32.mrb[0].mxu0 }
  0xe3   :  { %v2956_v47 = vpop.f32.mrb[6].mxu1  ;;  %v188_v48 = vpop.f32.mrb[1].mxu0 }
  0xe4   :  { %v416_v49 = vpop.f32.mrb[7].mxu1  ;;  %3144 = vmatpush3.bf16.xpose.msk.msra.mxu0 %vm3536_vm5, %v3139_v42  ;;  %3001 = vmatprep.mubr.msk.f32.mxu0 %vm465_vm4, %v188_v48 }
  0xe5   :  { %v3151_v50 = vpack.c.bf16 %v2956_v47, %v416_v49  ;;  %3147 = vmatprep.subr.msk.bf16.mxu0 %vm3536_vm5, %v3145_v45 }
  0xe6   :  { %v3553_v51 = vpop.f32.mrb[2].mxu0 }
  0xe7   :  { %v2959_v52 = vpop.f32.mrb[8].mxu1  ;;  %v198_v53 = vpop.f32.mrb[3].mxu0 }
  0xe8   :  { %v426_v54 = vpop.f32.mrb[9].mxu1 }
  0xe9   :  { %v3157_v55 = vpack.c.bf16 %v2959_v52, %v426_v54 }
  0xea   :  { %v3555_v56 = vpop.f32.mrb[4].mxu0 }
  0xeb   :  { %v2962_v57 = vpop.f32.mrb[10].mxu1  ;;  %v208_v58 = vpop.f32.mrb[5].mxu0 }
  0xec   :  { %v436_v59 = vpop.f32.mrb[11].mxu1  ;;  %3150 = vmatpush3.bf16.xpose.msk.msra.mxu0 %vm3536_vm5, %v3145_v45 }
  0xed   :  { %v3163_v60 = vpack.c.bf16 %v2962_v57, %v436_v59  ;;  %3153 = vmatprep.subr.msk.bf16.mxu0 %vm3536_vm5, %v3151_v50 }
  0xee   :  { %v3561_v61 = vpop.f32.mrb[6].mxu0 }
  0xef   :  { %v2965_v62 = vpop.f32.mrb[12].mxu1  ;;  %v218_v63 = vpop.f32.mrb[7].mxu0 }
  0xf0   :  { %v446_v0 = vpop.f32.mrb[13].mxu1 }
  0xf1   :  { %v3169_v1 = vpack.c.bf16 %v2965_v62, %v446_v0 }
  0xf2   :  { %v3563_v2 = vpop.f32.mrb[8].mxu0 }
  0xf3   :  { %v2968_v3 = vpop.f32.mrb[14].mxu1  ;;  %v3565_v4 = vpop.f32.mrb[9].mxu0 }
  0xf4   :  { %v456_v5 = vpop.f32.mrb[15].mxu1  ;;  %3156 = vmatpush3.bf16.xpose.msk.msra.mxu0 %vm3536_vm5, %v3151_v50 }
  0xf5   :  { %v3175_v6 = vpack.c.bf16 %v2968_v3, %v456_v5  ;;  %3159 = vmatprep.subr.msk.bf16.mxu0 %vm3536_vm5, %v3157_v55 }
  0xf6   :  { %v3571_v7 = vpop.f32.mrb[10].mxu0 }
  0xf7   :  { %v3573_v8 = vpop.f32.mrb[16].mxu1  ;;  %v3575_v9 = vpop.f32.mrb[11].mxu0 }
  0xf8   :  { %v3577_v10 = vpop.f32.mrb[17].mxu1 }
  0xfa   :  { %v3579_v11 = vpop.f32.mrb[12].mxu0 }
  0xfb   :  { %v3581_v12 = vpop.f32.mrb[18].mxu1  ;;  %v3583_v13 = vpop.f32.mrb[13].mxu0 }
  0xfc   :  { %3162 = vmatpush3.bf16.xpose.msk.msra.mxu0 %vm3536_vm5, %v3157_v55  ;;  %v3587_v14 = vpop.f32.mrb[19].mxu1 }
  0xfd   :  { %3165 = vmatprep.subr.msk.bf16.mxu0 %vm3536_vm5, %v3163_v60 }
  0xfe   :  { %v3591_v15 = vpop.f32.mrb[14].mxu0 }
  0xff   :  { %v3593_v16 = vpop.f32.mrb[20].mxu1  ;;  %v3595_v17 = vpop.f32.mrb[15].mxu0 }
 0x100   :  { %v3597_v18 = vpop.f32.mrb[21].mxu1 }
 0x103   :  { %v3599_v19 = vpop.f32.mrb[22].mxu1 }
 0x104   :  { %3168 = vmatpush3.bf16.xpose.msk.msra.mxu0 %vm3536_vm5, %v3163_v60  ;;  %v3603_v20 = vpop.f32.mrb[23].mxu1 }
 0x105   :  { %3171 = vmatprep.subr.msk.bf16.mxu0 %vm3536_vm5, %v3169_v1 }
 0x107   :  { %v3607_v21 = vpop.f32.mrb[24].mxu1 }
 0x108   :  { %v1625_v22 = vpop.f32.mrb[25].mxu1 }
 0x109   :  { %3121 = vmatprep.mubr.msk.f32.mxu1 %vm465_vm4, %v1625_v22 }
 0x10b   :  { %v3610_v23 = vpop.f32.mrb[26].mxu1 }
 0x10c   :  { %3174 = vmatpush3.bf16.xpose.msk.msra.mxu0 %vm3536_vm5, %v3169_v1  ;;  %v3614_v24 = vpop.f32.mrb[27].mxu1 }
 0x10d   :  { %3177 = vmatprep.subr.msk.bf16.mxu0 %vm3536_vm5, %v3175_v6 }
 0x10f   :  { %v3618_v25 = vpop.f32.mrb[28].mxu1 }
 0x110   :  { %v3620_v26 = vpop.f32.mrb[29].mxu1 }
 0x113   :  { %v3622_v27 = vpop.f32.mrb[30].mxu1 }
 0x114   :  { %3180 = vmatpush3.bf16.xpose.msk.msra.mxu0 %vm3536_vm5, %v3175_v6  ;;  %v3626_v28 = vpop.f32.mrb[31].mxu1 }
 0x117   :  { %v3055_v29 = vpop.f32.mrb[32].mxu1 }
 0x118   :  { %v1733_v30 = vpop.f32.mrb[33].mxu1 }
 0x119   :  { %v3181_v31 = vpack.c.bf16 %v3055_v29, %v1733_v30 }
 0x11b   :  { %3002 = vmatmul.mubr.msk.f32.vlgmr.msra.gmra.mrb[16].mxu0 %vm465_vm4, %v3546_v46  ;;  %3183 = vmatprep.subr.msk.bf16.mxu0 %vm3536_vm5, %v3181_v31  ;;  %v3058_v32 = vpop.f32.mrb[34].mxu1 }
 0x11c   :  { %3229 = vmatprep.subr.msk.bf16.mxu1 %vm3536_vm5, %v3181_v31  ;;  %3186 = vmatpush3.bf16.xpose.msk.msra.mxu0 %vm3536_vm5, %v3181_v31  ;;  %v1743_v33 = vpop.f32.mrb[35].mxu1 }
 0x11d   :  { %3237 = vmatpush3.bf16.xpose.msk.msra.mxu1 %vm3536_vm5, %v3181_v31  ;;  %3004 = vmatprep.mubr.msk.f32.mxu0 %vm465_vm4, %v198_v53  ;;  %v3187_v34 = vpack.c.bf16 %v3058_v32, %v1743_v33 }
 0x11f   :  { %3005 = vmatmul.mubr.msk.f32.gmra.mrb[18].mxu0 %vm465_vm4, %v3553_v51  ;;  %3189 = vmatprep.subr.msk.bf16.mxu0 %vm3536_vm5, %v3187_v34  ;;  %v3061_v35 = vpop.f32.mrb[36].mxu1 }
 0x120   :  { %3007 = vmatprep.mubr.msk.f32.mxu0 %vm465_vm4, %v208_v58  ;;  %3230 = vmatprep.subr.msk.bf16.mxu1 %vm3536_vm5, %v3187_v34  ;;  %v1753_v36 = vpop.f32.mrb[37].mxu1 }
 0x121   :  { %v3193_v37 = vpack.c.bf16 %v3061_v35, %v1753_v36 }
 0x123   :  { %3008 = vmatmul.mubr.msk.f32.gmra.mrb[20].mxu0 %vm465_vm4, %v3555_v56  ;;  %v3064_v39 = vpop.f32.mrb[38].mxu1 }
 0x124   :  { %3192 = vmatpush3.bf16.xpose.msk.msra.mxu0 %vm3536_vm5, %v3187_v34  ;;  %3010 = vmatprep.mubr.msk.f32.mxu0 %vm465_vm4, %v218_v63  ;;  %v1763_v40 = vpop.f32.mrb[39].mxu1 }
 0x125   :  { %3238 = vmatpush3.bf16.xpose.msk.msra.mxu1 %vm3536_vm5, %v3187_v34  ;;  %3195 = vmatprep.subr.msk.bf16.mxu0 %vm3536_vm5, %v3193_v37  ;;  %v3199_v41 = vpack.c.bf16 %v3064_v39, %v1763_v40 }
 0x126   :  { %3231 = vmatprep.subr.msk.bf16.mxu1 %vm3536_vm5, %v3193_v37 }
 0x127   :  { %3011 = vmatmul.mubr.msk.f32.gmra.mrb[22].mxu0 %vm465_vm4, %v3561_v61  ;;  %v3067_v42 = vpop.f32.mrb[40].mxu1 }
 0x128   :  { %3013 = vmatprep.mubr.msk.f32.mxu0 %vm465_vm4, %v3565_v4  ;;  %v1773_v43 = vpop.f32.mrb[41].mxu1 }
 0x129   :  { %v3205_v44 = vpack.c.bf16 %v3067_v42, %v1773_v43 }
 0x12b   :  { %3014 = vmatmul.mubr.msk.f32.gmra.mrb[24].mxu0 %vm465_vm4, %v3563_v2  ;;  %v3070_v45 = vpop.f32.mrb[42].mxu1 }
 0x12c   :  { %3198 = vmatpush3.bf16.xpose.msk.msra.mxu0 %vm3536_vm5, %v3193_v37  ;;  %3016 = vmatprep.mubr.msk.f32.mxu0 %vm465_vm4, %v3575_v9  ;;  %v1783_v46 = vpop.f32.mrb[43].mxu1 }
 0x12d   :  { %3239 = vmatpush3.bf16.xpose.msk.msra.mxu1 %vm3536_vm5, %v3193_v37  ;;  %3201 = vmatprep.subr.msk.bf16.mxu0 %vm3536_vm5, %v3199_v41  ;;  %v3211_v47 = vpack.c.bf16 %v3070_v45, %v1783_v46 }
 0x12e   :  { %3232 = vmatprep.subr.msk.bf16.mxu1 %vm3536_vm5, %v3199_v41 }
 0x12f   :  { %3017 = vmatmul.mubr.msk.f32.gmra.mrb[26].mxu0 %vm465_vm4, %v3571_v7  ;;  %v3073_v48 = vpop.f32.mrb[44].mxu1 }
 0x130   :  { %3019 = vmatprep.mubr.msk.f32.mxu0 %vm465_vm4, %v3583_v13  ;;  %v1793_v49 = vpop.f32.mrb[45].mxu1 }
 0x131   :  { %v3217_v50 = vpack.c.bf16 %v3073_v48, %v1793_v49 }
 0x133   :  { %3020 = vmatmul.mubr.msk.f32.gmra.mrb[28].mxu0 %vm465_vm4, %v3579_v11  ;;  %v3076_v51 = vpop.f32.mrb[46].mxu1 }
 0x134   :  { %3204 = vmatpush3.bf16.xpose.msk.msra.mxu0 %vm3536_vm5, %v3199_v41  ;;  %3022 = vmatprep.mubr.msk.f32.mxu0 %vm465_vm4, %v3595_v17  ;;  %v1803_v52 = vpop.f32.mrb[47].mxu1 }
 0x135   :  { %3240 = vmatpush3.bf16.xpose.msk.msra.mxu1 %vm3536_vm5, %v3199_v41  ;;  %3207 = vmatprep.subr.msk.bf16.mxu0 %vm3536_vm5, %v3205_v44  ;;  %v3223_v53 = vpack.c.bf16 %v3076_v51, %v1803_v52 }
 0x136   :  { %3233 = vmatprep.subr.msk.bf16.mxu1 %vm3536_vm5, %v3205_v44 }
 0x137   :  { %3023 = vmatmul.mubr.msk.f32.gmra.mrb[30].mxu0 %vm465_vm4, %v3591_v15 }
 0x138   :  { %3109 = vmatprep.mubr.msk.f32.mxu0 %vm465_vm4, %v3577_v10 }
 0x13c   :  { %3210 = vmatpush3.bf16.xpose.msk.msra.mxu0 %vm3536_vm5, %v3205_v44 }
 0x13d   :  { %3241 = vmatpush3.bf16.xpose.msk.msra.mxu1 %vm3536_vm5, %v3205_v44  ;;  %3213 = vmatprep.subr.msk.bf16.mxu0 %vm3536_vm5, %v3211_v47 }
 0x13e   :  { %3234 = vmatprep.subr.msk.bf16.mxu1 %vm3536_vm5, %v3211_v47 }
 0x144   :  { %3216 = vmatpush3.bf16.xpose.msk.msra.mxu0 %vm3536_vm5, %v3211_v47 }
 0x145   :  { %3242 = vmatpush3.bf16.xpose.msk.msra.mxu1 %vm3536_vm5, %v3211_v47  ;;  %3219 = vmatprep.subr.msk.bf16.mxu0 %vm3536_vm5, %v3217_v50 }
 0x146   :  { %3235 = vmatprep.subr.msk.bf16.mxu1 %vm3536_vm5, %v3217_v50 }
 0x14c   :  { %3222 = vmatpush3.bf16.xpose.msk.msra.mxu0 %vm3536_vm5, %v3217_v50 }
 0x14d   :  { %3243 = vmatpush3.bf16.xpose.msk.msra.mxu1 %vm3536_vm5, %v3217_v50  ;;  %3225 = vmatprep.subr.msk.bf16.mxu0 %vm3536_vm5, %v3223_v53 }
 0x14e   :  { %3236 = vmatprep.subr.msk.bf16.mxu1 %vm3536_vm5, %v3223_v53 }
 0x154   :  { %3228 = vmatpush3.bf16.xpose.msk.msra.mxu0 %vm3536_vm5, %v3223_v53 }
 0x155   :  { %3244 = vmatpush3.bf16.xpose.msk.msra.mxu1 %vm3536_vm5, %v3223_v53 }
 0x15b   :  { %3110 = vmatmul.mubr.msk.f32.vlgmr.msra.gmra.mrb[32].mxu0 %vm465_vm4, %v3573_v8 }
 0x15c   :  { %3122 = vmatmul.mubr.msk.f32.vlgmr.msra.gmra.mrb[48].mxu1 %vm465_vm4, %v3607_v21  ;;  %3112 = vmatprep.mubr.msk.f32.mxu0 %vm465_vm4, %v3587_v14  ;;  %v50_v21 = vlaneseq }
 0x15d   :  { %3124 = vmatprep.mubr.msk.f32.mxu1 %vm465_vm4, %v3614_v24 }
 0x15e   :  { %v3825_v22 = vshrl.u32 %v50_v21, 7 }
 0x15f   :  { %3113 = vmatmul.mubr.msk.f32.gmra.mrb[34].mxu0 %vm465_vm4, %v3581_v12 }
 0x160   :  { %3125 = vmatmul.mubr.msk.f32.gmra.mrb[50].mxu1 %vm465_vm4, %v3610_v23  ;;  %3115 = vmatprep.mubr.msk.f32.mxu0 %vm465_vm4, %v3597_v18  ;;  %v3828_v23 = vadd.s32 120, %v3825_v22  ;;  %v3858_v32 = vadd.s32 88, %v3825_v22  ;;  %v3874_v40 = vadd.s32 104, %v3825_v22  ;;  %v3887_v44 = vadd.s32 112, %v3825_v22 }
 0x161   :  { %3127 = vmatprep.mubr.msk.f32.mxu1 %vm465_vm4, %v3620_v26  ;;  %v3921_v53 = vadd.s32 24, %v3825_v22  ;;  %v4020_v46 = vadd.s32 80, %v3825_v22 }
 0x162   :  { %v722_v24 = vand.u32 1, %v3828_v23  ;;  %v718_v33 = vand.u32 1, %v3858_v32  ;;  %v720_v43 = vand.u32 1, %v3874_v40  ;;  %v721_v47 = vand.u32 1, %v3887_v44 }
 0x163   :  { %3116 = vmatmul.mubr.msk.f32.gmra.mrb[36].mxu0 %vm465_vm4, %v3593_v16  ;;  %v834_v21 = vand.u32 2, %v3828_v23 }
 0x164   :  { %3128 = vmatmul.mubr.msk.f32.gmra.mrb[52].mxu1 %vm465_vm4, %v3618_v25  ;;  %3118 = vmatprep.mubr.msk.f32.mxu0 %vm465_vm4, %v3603_v20  ;;  %vm3831_vm6 = vcmp.ne.s32.totalorder %v722_v24, 0  ;;  %vm3869_vm8 = vcmp.ne.s32.totalorder %v718_v33, 0  ;;  %vm3893_vm9 = vcmp.ne.s32.totalorder %v720_v43, 0  ;;  %vm3907_vm10 = vcmp.ne.s32.totalorder %v721_v47, 0 }
 0x165   :  { %3130 = vmatprep.mubr.msk.f32.mxu1 %vm465_vm4, %v3626_v28  ;;  %v3842_v28 = vadd.s32 56, %v3825_v22  ;;  %vm3975_vm12 = vcmp.ne.s32.totalorder %v834_v21, 0  ;;  %v4014_v43 = vadd.s32 72, %v3825_v22 }
 0x167   :  { %3119 = vmatmul.mubr.msk.f32.gmra.mrb[38].mxu0 %vm465_vm4, %v3599_v19  ;;  %v714_v29 = vand.u32 1, %v3842_v28 }
 0x168   :  { %3131 = vmatmul.mubr.msk.f32.gmra.mrb[54].mxu1 %vm465_vm4, %v3622_v27 }
 0x169   :  { %vm730_vm7 = vcmp.ne.s32.totalorder %v714_v29, 0 }
 0x1ee   :  { %v3749_v38 = vpop.f32.mrb[16].mxu0 }
 0x1ef   :  { %v3751_v54 = vpop.f32.mrb[17].mxu0 }
 0x1f2   :  { %v3753_v55 = vpop.f32.mrb[18].mxu0 }
 0x1f3   :  { %v3755_v56 = vpop.f32.mrb[19].mxu0 }
 0x1f6   :  { %v3757_v57 = vpop.f32.mrb[20].mxu0 }
 0x1f7   :  { %v3759_v58 = vpop.f32.mrb[21].mxu0 }
 0x1fa   :  { %v3012_v59 = vpop.f32.mrb[22].mxu0 }
 0x1fb   :  { %769 = vrot.lane.b32.xlu1 %v3012_v59, %s3277_s2  ;;  %v3762_v60 = vpop.f32.mrb[23].mxu0 }
 0x1fe   :  { %v3764_v61 = vpop.f32.mrb[24].mxu0 }
 0x1ff   :  { %v3766_v62 = vpop.f32.mrb[25].mxu0 }
 0x202   :  { %v3768_v63 = vpop.f32.mrb[26].mxu0 }
 0x203   :  { %v3770_v0 = vpop.f32.mrb[27].mxu0 }
 0x206   :  { %v3772_v1 = vpop.f32.mrb[28].mxu0 }
 0x207   :  { %v3774_v2 = vpop.f32.mrb[29].mxu0 }
 0x20a   :  { %v3024_v3 = vpop.f32.mrb[30].mxu0 }
 0x20b   :  { %785 = vrot.lane.b32.xlu0 %v3024_v3, %s3277_s2  ;;  %v3777_v4 = vpop.f32.mrb[31].mxu0 }
 0x22e   :  { %v3779_v5 = vpop.f32.mrb[32].mxu0 }
 0x22f   :  { %v3781_v6 = vpop.f32.mrb[48].mxu1  ;;  %v3783_v7 = vpop.f32.mrb[33].mxu0 }
 0x230   :  { %v3785_v8 = vpop.f32.mrb[49].mxu1 }
 0x232   :  { %v3787_v9 = vpop.f32.mrb[34].mxu0 }
 0x233   :  { %v3789_v10 = vpop.f32.mrb[50].mxu1  ;;  %v3791_v11 = vpop.f32.mrb[35].mxu0 }
 0x234   :  { %v3793_v12 = vpop.f32.mrb[51].mxu1 }
 0x236   :  { %v3795_v13 = vpop.f32.mrb[36].mxu0 }
 0x237   :  { %v3797_v14 = vpop.f32.mrb[52].mxu1  ;;  %v3799_v15 = vpop.f32.mrb[37].mxu0 }
 0x238   :  { %v3801_v16 = vpop.f32.mrb[53].mxu1 }
 0x23a   :  { %v3120_v17 = vpop.f32.mrb[38].mxu0 }
 0x23b   :  { %v3132_v18 = vpop.f32.mrb[54].mxu1  ;;  %2083 = vrot.lane.b32.xlu1 %v3120_v17, %s3277_s2  ;;  %v3804_v19 = vpop.f32.mrb[39].mxu0 }
 0x23c   :  { %v3806_v20 = vpop.f32.mrb[55].mxu1  ;;  %2099 = vrot.lane.b32.xlu0 %v3132_v18, %s3277_s2 }
 0x23f   :  { %2091 = vrot.lane.b32.xlu1 %v3789_v10, %s3277_s2 }
 0x240   :  { %777 = vrot.lane.b32.xlu0 %v3768_v63, %s3277_s2 }
 0x243   :  { %2095 = vrot.lane.b32.xlu1 %v3797_v14, %s3277_s2 }
 0x244   :  { %781 = vrot.lane.b32.xlu0 %v3772_v1, %s3277_s2 }
 0x247   :  { %2075 = vrot.lane.b32.xlu1 %v3787_v9, %s3277_s2 }
 0x248   :  { %783 = vrot.lane.b32.xlu0 %v3777_v4, %s3277_s2 }
 0x24b   :  { %2097 = vrot.lane.b32.xlu1 %v3806_v20, %s3277_s2 }
 0x24c   :  { %761 = vrot.lane.b32.xlu0 %v3753_v55, %s3277_s2 }
 0x26d   :  { %v770_v30 = vpop.permute.xlu1 %769 }
 0x26e   :  { %v3849_v31 = vsel %vm730_vm7, %v770_v30, %v3012_v59 }
 0x27d   :  { %v786_v26 = vpop.permute.xlu0 %785 }
 0x27e   :  { %v3837_v27 = vsel %vm3831_vm6, %v786_v26, %v3024_v3  ;;  %v3981_v26 = vadd.s32 48, %v3825_v22 }
 0x27f   :  { %897 = vrot.lane.b32.xlu0 %v3837_v27, %s3278_s30 }
 0x280   :  { %v713_v33 = vand.u32 1, %v3981_v26 }
 0x282   :  { %vm4002_vm14 = vcmp.ne.s32.totalorder %v713_v33, 0 }
 0x283   :  { %765 = vrot.lane.b32.xlu0 %v3757_v57, %s3277_s2 }
 0x287   :  { %767 = vrot.lane.b32.xlu0 %v3762_v60, %s3277_s2 }
 0x28b   :  { %881 = vrot.lane.b32.xlu0 %v3849_v31, %s3278_s30 }
 0x28f   :  { %773 = vrot.lane.b32.xlu0 %v3764_v61, %s3277_s2 }
 0x293   :  { %775 = vrot.lane.b32.xlu0 %v3770_v0, %s3277_s2 }
 0x2ad   :  { %v2084_v34 = vpop.permute.xlu1 %2083 }
 0x2ae   :  { %v2100_v35 = vpop.permute.xlu0 %2099  ;;  %v3861_v36 = vsel %vm730_vm7, %v2084_v34, %v3120_v17 }
 0x2af   :  { %v3865_v37 = vsel %vm3831_vm6, %v2100_v35, %v3132_v18 }
 0x2b0   :  { %2179 = vrot.lane.b32.xlu1 %v3865_v37, %s3278_s30 }
 0x2b1   :  { %v2092_v52 = vpop.permute.xlu1 %2091 }
 0x2b2   :  { %v778_v41 = vpop.permute.xlu0 %777  ;;  %v3926_v59 = vsel %vm3869_vm8, %v2092_v52, %v3789_v10 }
 0x2b3   :  { %v3879_v42 = vsel %vm3869_vm8, %v778_v41, %v3768_v63  ;;  %v710_v63 = vand.u32 1, %v3921_v53 }
 0x2b4   :  { %889 = vrot.lane.b32.xlu0 %v3879_v42, %s3278_s30  ;;  %2079 = vrot.lane.b32.xlu1 %v3795_v13, %s3277_s2 }
 0x2b5   :  { %vm726_vm11 = vcmp.ne.s32.totalorder %v710_v63, 0 }
 0x2b6   :  { %v782_v45 = vpop.permute.xlu0 %781 }
 0x2b7   :  { %v3901_v48 = vsel %vm3893_vm9, %v782_v45, %v3772_v1  ;;  %v2096_v1 = vpop.permute.xlu1 %2095  ;;  %v716_v45 = vand.u32 1, %v4014_v43 }
 0x2b8   :  { %779 = vrot.lane.b32.xlu0 %v3774_v2, %s3277_s2  ;;  %2081 = vrot.lane.b32.xlu1 %v3804_v19, %s3277_s2  ;;  %v3943_v10 = vsel %vm3893_vm9, %v2096_v1, %v3797_v14 }
 0x2b9   :  { %vm4024_vm15 = vcmp.ne.s32.totalorder %v716_v45, 0 }
 0x2ba   :  { %v784_v49 = vpop.permute.xlu0 %783 }
 0x2bb   :  { %v3914_v51 = vsel %vm3907_vm10, %v784_v49, %v3777_v4  ;;  %v717_v49 = vand.u32 1, %v4020_v46 }
 0x2bc   :  { %893 = vrot.lane.b32.xlu0 %v3901_v48, %s3278_s30  ;;  %2087 = vrot.lane.b32.xlu1 %v3781_v6, %s3277_s2 }
 0x2bd   :  { %vm4036_vm0 = vcmp.ne.s32.totalorder %v717_v49, 0 }
 0x2be   :  { %v762_v3 = vpop.permute.xlu0 %761 }
 0x2bf   :  { %v3938_v4 = vsel %vm726_vm11, %v762_v3, %v3753_v55  ;;  %v2076_v55 = vpop.permute.xlu1 %2075  ;;  %v830_v3 = vand.u32 2, %v3858_v32 }
 0x2c0   :  { %895 = vrot.lane.b32.xlu0 %v3914_v51, %s3278_s30  ;;  %2089 = vrot.lane.b32.xlu1 %v3793_v12, %s3277_s2  ;;  %v3958_v14 = vsel %vm726_vm11, %v2076_v55, %v3787_v9  ;;  %v3973_v9 = vadd.s32 40, %v3825_v22 }
 0x2c1   :  { %vm4058_vm1 = vcmp.ne.s32.totalorder %v830_v3, 0 }
 0x2c2   :  { %v712_v25 = vand.u32 1, %v3973_v9 }
 0x2c3   :  { %v2098_v17 = vpop.permute.xlu1 %2097 }
 0x2c4   :  { %757 = vrot.lane.b32.xlu0 %v3749_v38, %s3277_s2  ;;  %2171 = vrot.lane.b32.xlu1 %v3926_v59, %s3278_s30  ;;  %v3967_v18 = vsel %vm3907_vm10, %v2098_v17, %v3806_v20  ;;  %vm3990_vm13 = vcmp.ne.s32.totalorder %v712_v25, 0 }
 0x2c8   :  { %759 = vrot.lane.b32.xlu0 %v3755_v56, %s3277_s2  ;;  %2093 = vrot.lane.b32.xlu1 %v3801_v16, %s3277_s2 }
 0x2cc   :  { %873 = vrot.lane.b32.xlu0 %v3938_v4, %s3278_s30  ;;  %2175 = vrot.lane.b32.xlu1 %v3943_v10, %s3278_s30 }
 0x2d0   :  { %763 = vrot.lane.b32.xlu0 %v3759_v58, %s3277_s2  ;;  %2071 = vrot.lane.b32.xlu1 %v3779_v5, %s3277_s2 }
 0x2d4   :  { %2073 = vrot.lane.b32.xlu1 %v3791_v11, %s3277_s2 }
 0x2d8   :  { %2163 = vrot.lane.b32.xlu1 %v3861_v36, %s3278_s30 }
 0x2dc   :  { %2155 = vrot.lane.b32.xlu1 %v3958_v14, %s3278_s30 }
 0x2e0   :  { %2077 = vrot.lane.b32.xlu1 %v3799_v15, %s3277_s2 }
 0x2e4   :  { %2177 = vrot.lane.b32.xlu1 %v3967_v18, %s3278_s30 }
 0x2f1   :  { %v898_v29 = vpop.permute.xlu0 %897 }
 0x2f2   :  { %v3986_v20 = vsel %vm3975_vm12, %v898_v29, %v3837_v27 }
 0x2f3   :  { %1009 = vrot.lane.b32.xlu0 %v3986_v20, %s3279_s5 }
 0x2f5   :  { %v766_v34 = vpop.permute.xlu0 %765 }
 0x2f6   :  { %v3998_v35 = vsel %vm3990_vm13, %v766_v34, %v3757_v57  ;;  %v832_v34 = vand.u32 2, %v3874_v40 }
 0x2f7   :  { %877 = vrot.lane.b32.xlu0 %v3998_v35, %s3278_s30 }
 0x2f8   :  { %vm4097_vm3 = vcmp.ne.s32.totalorder %v832_v34, 0  ;;  %v4143_v34 = vadd.s32 16, %v3825_v22 }
 0x2f9   :  { %v768_v39 = vpop.permute.xlu0 %767 }
 0x2fa   :  { %v4009_v41 = vsel %vm4002_vm14, %v768_v39, %v3762_v60  ;;  %v709_v60 = vand.u32 1, %v4143_v34 }
 0x2fb   :  { %879 = vrot.lane.b32.xlu0 %v4009_v41, %s3278_s30 }
 0x2fc   :  { %vm4173_vm7 = vcmp.ne.s32.totalorder %v709_v60, 0 }
 0x2fd   :  { %v882_v57 = vpop.permute.xlu0 %881 }
 0x2ff   :  { %771 = vrot.lane.b32.xlu0 %v3766_v62, %s3277_s2 }
 0x301   :  { %v774_v47 = vpop.permute.xlu0 %773 }
 0x302   :  { %v4032_v50 = vsel %vm4024_vm15, %v774_v47, %v3764_v61  ;;  %v4049_v61 = vadd.s32 96, %v3825_v22 }
 0x303   :  { %2085 = vrot.lane.b32.xlu0 %v3785_v8, %s3277_s2 }
 0x304   :  { %v719_v21 = vand.u32 1, %v4049_v61 }
 0x305   :  { %v776_v52 = vpop.permute.xlu0 %775 }
 0x306   :  { %v4043_v1 = vsel %vm4036_vm0, %v776_v52, %v3770_v0  ;;  %vm4077_vm2 = vcmp.ne.s32.totalorder %v719_v21, 0  ;;  %v4125_v21 = vadd.s32 8, %v3825_v22 }
 0x307   :  { %885 = vrot.lane.b32.xlu0 %v4032_v50, %s3278_s30 }
 0x30b   :  { %887 = vrot.lane.b32.xlu0 %v4043_v1, %s3278_s30 }
 0x322   :  { %v2180_v55 = vpop.permute.xlu1 %2179 }
 0x323   :  { %v4054_v17 = vsel %vm3975_vm12, %v2180_v55, %v3865_v37  ;;  %v824_v55 = vand.u32 2, %v3973_v9 }
 0x324   :  { %2259 = vrot.lane.b32.xlu1 %v4054_v17, %s3279_s5 }
 0x325   :  { %vm4272_vm11 = vcmp.ne.s32.totalorder %v824_v55, 0 }
 0x326   :  { %v890_v25 = vpop.permute.xlu0 %889  ;;  %v2080_v29 = vpop.permute.xlu1 %2079 }
 0x327   :  { %v4066_v33 = vsel %vm4058_vm1, %v890_v25, %v3879_v42  ;;  %v4071_v37 = vsel %vm3990_vm13, %v2080_v29, %v3795_v13  ;;  %v826_v42 = vand.u32 2, %v3842_v28  ;;  %v708_v29 = vand.u32 1, %v4125_v21 }
 0x328   :  { %1001 = vrot.lane.b32.xlu0 %v4066_v33, %s3279_s5  ;;  %2159 = vrot.lane.b32.xlu1 %v4071_v37, %s3278_s30 }
 0x329   :  { %vm4101_vm4 = vcmp.ne.s32.totalorder %v826_v42, 0  ;;  %vm4154_vm6 = vcmp.ne.s32.totalorder %v708_v29, 0 }
 0x32a   :  { %v780_v39 = vpop.permute.xlu0 %779  ;;  %v2082_v45 = vpop.permute.xlu1 %2081  ;;  %v4114_v3 = vsel %vm4101_vm4, %v882_v57, %v3849_v31 }
 0x32b   :  { %v4086_v13 = vsel %vm4077_vm2, %v780_v39, %v3774_v2  ;;  %v4091_v30 = vsel %vm4002_vm14, %v2082_v45, %v3804_v19  ;;  %v833_v2 = vand.u32 2, %v3887_v44 }
 0x32c   :  { %891 = vrot.lane.b32.xlu0 %v4086_v13, %s3278_s30  ;;  %2161 = vrot.lane.b32.xlu1 %v4091_v30, %s3278_s30 }
 0x32d   :  { %vm4120_vm5 = vcmp.ne.s32.totalorder %v833_v2, 0 }
 0x32e   :  { %v894_v52 = vpop.permute.xlu0 %893  ;;  %v2088_v27 = vpop.permute.xlu1 %2087 }
 0x32f   :  { %v4109_v19 = vsel %vm4097_vm3, %v894_v52, %v3901_v48  ;;  %v4135_v57 = vsel %vm4024_vm15, %v2088_v27, %v3781_v6  ;;  %v822_v27 = vand.u32 2, %v3921_v53  ;;  %v4249_v6 = vadd.s32 32, %v3825_v22 }
 0x330   :  { %1005 = vrot.lane.b32.xlu0 %v4109_v19, %s3279_s5  ;;  %993 = vrot.lane.b32.xlu1 %v4114_v3, %s3279_s5 }
 0x331   :  { %vm4192_vm8 = vcmp.ne.s32.totalorder %v822_v27, 0 }
 0x332   :  { %v896_v48 = vpop.permute.xlu0 %895  ;;  %v2090_v25 = vpop.permute.xlu1 %2089 }
 0x333   :  { %v4130_v31 = vsel %vm4120_vm5, %v896_v48, %v3914_v51  ;;  %v4148_v51 = vsel %vm4036_vm0, %v2090_v25, %v3793_v12  ;;  %v4278_v25 = vadd.s32 64, %v3825_v22 }
 0x334   :  { %1007 = vrot.lane.b32.xlu0 %v4130_v31, %s3279_s5  ;;  %2167 = vrot.lane.b32.xlu1 %v4135_v57, %s3278_s30 }
 0x336   :  { %v758_v42 = vpop.permute.xlu0 %757  ;;  %v2172_v39 = vpop.permute.xlu1 %2171 }
 0x337   :  { %v4162_v63 = vsel %vm4154_vm6, %v758_v42, %v3749_v38  ;;  %v4167_v12 = vsel %vm4058_vm1, %v2172_v39, %v3926_v59 }
 0x338   :  { %755 = vrot.lane.b32.xlu0 %v3751_v54, %s3277_s2  ;;  %2169 = vrot.lane.b32.xlu1 %v4148_v51, %s3278_s30 }
 0x33a   :  { %v760_v45 = vpop.permute.xlu0 %759  ;;  %v2094_v2 = vpop.permute.xlu1 %2093 }
 0x33b   :  { %v4181_v38 = vsel %vm4173_vm7, %v760_v45, %v3755_v56  ;;  %v4186_v59 = vsel %vm4077_vm2, %v2094_v2, %v3801_v16  ;;  %v711_v2 = vand.u32 1, %v4249_v6 }
 0x33c   :  { %869 = vrot.lane.b32.xlu0 %v4162_v63, %s3278_s30  ;;  %2251 = vrot.lane.b32.xlu1 %v4167_v12, %s3279_s5 }
 0x33d   :  { %vm4260_vm10 = vcmp.ne.s32.totalorder %v711_v2, 0 }
 0x33e   :  { %v2176_v48 = vpop.permute.xlu1 %2175  ;;  %v874_v0 = vpop.permute.xlu0 %873 }
 0x33f   :  { %v4199_v56 = vsel %vm4192_vm8, %v874_v0, %v3938_v4  ;;  %v4204_v16 = vsel %vm4097_vm3, %v2176_v48, %v3943_v10  ;;  %v825_v0 = vand.u32 2, %v3981_v26 }
 0x340   :  { %871 = vrot.lane.b32.xlu0 %v4181_v38, %s3278_s30  ;;  %2173 = vrot.lane.b32.xlu1 %v4186_v59, %s3278_s30 }
 0x341   :  { %vm4287_vm12 = vcmp.ne.s32.totalorder %v825_v0, 0  ;;  %v942_v0 = vand.u32 4, %v3858_v32 }
 0x342   :  { %v2072_v29 = vpop.permute.xlu1 %2071  ;;  %v764_v45 = vpop.permute.xlu0 %763 }
 0x343   :  { %v4215_v4 = vsel %vm4154_vm6, %v2072_v29, %v3779_v5  ;;  %v4268_v48 = vsel %vm4260_vm10, %v764_v45, %v3759_v58  ;;  %v828_v45 = vand.u32 2, %v4014_v43  ;;  %vm4338_vm0 = vcmp.ne.s32.totalorder %v942_v0, 0 }
 0x344   :  { %985 = vrot.lane.b32.xlu0 %v4199_v56, %s3279_s5  ;;  %2255 = vrot.lane.b32.xlu1 %v4204_v16, %s3279_s5 }
 0x345   :  { %vm4310_vm14 = vcmp.ne.s32.totalorder %v828_v45, 0 }
 0x346   :  { %v2074_v24 = vpop.permute.xlu1 %2073 }
 0x347   :  { %v4229_v60 = vsel %vm4173_vm7, %v2074_v24, %v3791_v11  ;;  %v946_v11 = vand.u32 4, %v3828_v23 }
 0x348   :  { %2069 = vrot.lane.b32.xlu1 %v3783_v7, %s3277_s2 }
 0x349   :  { %vm4251_vm9 = vcmp.ne.s32.totalorder %v946_v11, 0 }
 0x34a   :  { %v2164_v42 = vpop.permute.xlu1 %2163 }
 0x34b   :  { %v4222_v47 = vsel %vm4101_vm4, %v2164_v42, %v3861_v36  ;;  %v715_v42 = vand.u32 1, %v4278_v25 }
 0x34c   :  { %2151 = vrot.lane.b32.xlu1 %v4215_v4, %s3278_s30 }
 0x34d   :  { %vm731_vm13 = vcmp.ne.s32.totalorder %v715_v42, 0 }
 0x34e   :  { %v2156_v10 = vpop.permute.xlu1 %2155 }
 0x34f   :  { %v4236_v5 = vsel %vm4192_vm8, %v2156_v10, %v3958_v14  ;;  %v944_v14 = vand.u32 4, %v3874_v40 }
 0x350   :  { %2243 = vrot.lane.b32.xlu1 %v4222_v47, %s3279_s5 }
 0x351   :  { %vm4373_vm2 = vcmp.ne.s32.totalorder %v944_v14, 0  ;;  %v821_v14 = vand.u32 2, %v4143_v34 }
 0x352   :  { %v2078_v39 = vpop.permute.xlu1 %2077 }
 0x353   :  { %v4349_v32 = vsel %vm4260_vm10, %v2078_v39, %v3799_v15  ;;  %v945_v39 = vand.u32 4, %v3887_v44  ;;  %vm4445_vm7 = vcmp.ne.s32.totalorder %v821_v14, 0 }
 0x354   :  { %2153 = vrot.lane.b32.xlu1 %v4229_v60, %s3278_s30 }
 0x355   :  { %vm4390_vm3 = vcmp.ne.s32.totalorder %v945_v39, 0 }
 0x356   :  { %v2178_v49 = vpop.permute.xlu1 %2177 }
 0x357   :  { %v4243_v36 = vsel %vm4120_vm5, %v2178_v49, %v3967_v18 }
 0x358   :  { %2235 = vrot.lane.b32.xlu1 %v4236_v5, %s3279_s5 }
 0x35c   :  { %2257 = vrot.lane.b32.xlu1 %v4243_v36, %s3279_s5 }
 0x365   :  { %v1010_v52 = vpop.permute.xlu0 %1009 }
 0x366   :  { %v1042_v18 = vsel %vm4251_vm9, %v1010_v52, %v3986_v20 }
 0x367   :  { %1121 = vrot.lane.b32.xlu0 %v1042_v18, %s3280_s6  ;;  %v829_v18 = vand.u32 2, %v4020_v46 }
 0x369   :  { %v878_v27 = vpop.permute.xlu0 %877  ;;  %vm4322_vm15 = vcmp.ne.s32.totalorder %v829_v18, 0 }
 0x36a   :  { %v4283_v24 = vsel %vm4272_vm11, %v878_v27, %v3998_v35 }
 0x36b   :  { %875 = vrot.lane.b32.xlu0 %v4268_v48, %s3278_s30 }
 0x36d   :  { %v880_v29 = vpop.permute.xlu0 %879 }
 0x36e   :  { %v4295_v49 = vsel %vm4287_vm12, %v880_v29, %v4009_v41 }
 0x36f   :  { %989 = vrot.lane.b32.xlu0 %v4283_v24, %s3279_s5 }
 0x371   :  { %v772_v10 = vpop.permute.xlu0 %771 }
 0x372   :  { %v4300_v11 = vsel %vm731_vm13, %v772_v10, %v3766_v62  ;;  %v831_v10 = vand.u32 2, %v4049_v61 }
 0x373   :  { %991 = vrot.lane.b32.xlu0 %v4295_v49, %s3279_s5 }
 0x374   :  { %vm4354_vm1 = vcmp.ne.s32.totalorder %v831_v10, 0  ;;  %v820_v10 = vand.u32 2, %v4125_v21 }
 0x375   :  { %v2086_v35 = vpop.permute.xlu0 %2085 }
 0x376   :  { %v4306_v52 = vsel %vm731_vm13, %v2086_v35, %v3785_v8  ;;  %vm4426_vm6 = vcmp.ne.s32.totalorder %v820_v10, 0 }
 0x377   :  { %883 = vrot.lane.b32.xlu0 %v4300_v11, %s3278_s30 }
 0x379   :  { %v886_v2 = vpop.permute.xlu0 %885 }
 0x37a   :  { %v4318_v62 = vsel %vm4310_vm14, %v886_v2, %v4032_v50 }
 0x37b   :  { %2165 = vrot.lane.b32.xlu0 %v4306_v52, %s3278_s30 }
 0x37d   :  { %v888_v55 = vpop.permute.xlu0 %887 }
 0x37e   :  { %v4329_v27 = vsel %vm4322_vm15, %v888_v55, %v4043_v1 }
 0x37f   :  { %997 = vrot.lane.b32.xlu0 %v4318_v62, %s3279_s5 }
 0x383   :  { %999 = vrot.lane.b32.xlu0 %v4329_v27, %s3279_s5 }
 0x396   :  { %v2260_v50 = vpop.permute.xlu1 %2259 }
 0x397   :  { %v2292_v29 = vsel %vm4251_vm9, %v2260_v50, %v4054_v17 }
 0x398   :  { %2339 = vrot.lane.b32.xlu1 %v2292_v29, %s3280_s6 }
 0x39a   :  { %v1002_v1 = vpop.permute.xlu0 %1001  ;;  %v2160_v35 = vpop.permute.xlu1 %2159 }
 0x39b   :  { %v1038_v45 = vsel %vm4338_vm0, %v1002_v1, %v4066_v33  ;;  %v4367_v15 = vsel %vm4272_vm11, %v2160_v35, %v4071_v37 }
 0x39c   :  { %1113 = vrot.lane.b32.xlu0 %v1038_v45, %s3280_s6  ;;  %2157 = vrot.lane.b32.xlu1 %v4349_v32, %s3278_s30 }
 0x39e   :  { %v892_v2 = vpop.permute.xlu0 %891  ;;  %v2162_v18 = vpop.permute.xlu1 %2161 }
 0x39f   :  { %v4362_v33 = vsel %vm4354_vm1, %v892_v2, %v4086_v13  ;;  %v938_v13 = vand.u32 4, %v3842_v28  ;;  %v4385_v20 = vsel %vm4287_vm12, %v2162_v18, %v4091_v30 }
 0x3a0   :  { %1003 = vrot.lane.b32.xlu0 %v4362_v33, %s3279_s5  ;;  %2239 = vrot.lane.b32.xlu1 %v4367_v15, %s3279_s5 }
 0x3a1   :  { %vm4394_vm4 = vcmp.ne.s32.totalorder %v938_v13, 0 }
 0x3a2   :  { %v1006_v23 = vpop.permute.xlu0 %1005  ;;  %v994_v55 = vpop.permute.xlu1 %993 }
 0x3a3   :  { %v1040_v37 = vsel %vm4373_vm2, %v1006_v23, %v4109_v19  ;;  %v707_v19 = vand.u32 1, %v3825_v22  ;;  %v1034_v58 = vsel %vm4394_vm4, %v994_v55, %v4114_v3 }
 0x3a4   :  { %1117 = vrot.lane.b32.xlu0 %v1040_v37, %s3280_s6  ;;  %2241 = vrot.lane.b32.xlu1 %v4385_v20, %s3279_s5 }
 0x3a5   :  { %vm4407_vm5 = vcmp.ne.s32.totalorder %v707_v19, 0  ;;  %v934_v19 = vand.u32 4, %v3921_v53  ;;  %v936_v53 = vand.u32 4, %v3973_v9 }
 0x3a6   :  { %v1008_v0 = vpop.permute.xlu0 %1007  ;;  %v2168_v50 = vpop.permute.xlu1 %2167 }
 0x3a7   :  { %v1041_v30 = vsel %vm4390_vm3, %v1008_v0, %v4130_v31  ;;  %v4420_v3 = vsel %vm4310_vm14, %v2168_v50, %v4135_v57  ;;  %vm4501_vm8 = vcmp.ne.s32.totalorder %v934_v19, 0  ;;  %vm4521_vm10 = vcmp.ne.s32.totalorder %v936_v53, 0 }
 0x3a8   :  { %1231 = vrot.lane.b32.xlu0 %v1041_v30, %s3281_s7  ;;  %1105 = vrot.lane.b32.xlu1 %v1034_v58, %s3280_s6  ;;  %v819_v19 = vand.u32 2, %v3825_v22 }
 0x3aa   :  { %v756_v1 = vpop.permute.xlu0 %755  ;;  %v2170_v35 = vpop.permute.xlu1 %2169 }
 0x3ab   :  { %v4415_v31 = vsel %vm4407_vm5, %v756_v1, %v3751_v54  ;;  %v4439_v57 = vsel %vm4322_vm15, %v2170_v35, %v4148_v51 }
 0x3ac   :  { %867 = vrot.lane.b32.xlu0 %v4415_v31, %s3278_s30  ;;  %2247 = vrot.lane.b32.xlu1 %v4420_v3, %s3279_s5 }
 0x3ae   :  { %v870_v2 = vpop.permute.xlu0 %869  ;;  %v2252_v54 = vpop.permute.xlu1 %2251 }
 0x3af   :  { %v4434_v41 = vsel %vm4426_vm6, %v870_v2, %v4162_v63  ;;  %v2288_v51 = vsel %vm4338_vm0, %v2252_v54, %v4167_v12  ;;  %vm835_vm0 = vcmp.ne.s32.totalorder %v819_v19, 0 }
 0x3b0   :  { %981 = vrot.lane.b32.xlu0 %v4434_v41, %s3279_s5  ;;  %2249 = vrot.lane.b32.xlu1 %v4439_v57, %s3279_s5 }
 0x3b2   :  { %v872_v39 = vpop.permute.xlu0 %871  ;;  %v2174_v13 = vpop.permute.xlu1 %2173 }
 0x3b3   :  { %v4452_v63 = vsel %vm4445_vm7, %v872_v39, %v4181_v38  ;;  %v4463_v23 = vsel %vm4354_vm1, %v2174_v13, %v4186_v59 }
 0x3b4   :  { %983 = vrot.lane.b32.xlu0 %v4452_v63, %s3279_s5  ;;  %2331 = vrot.lane.b32.xlu1 %v2288_v51, %s3280_s6 }
 0x3b6   :  { %v2256_v8 = vpop.permute.xlu1 %2255 }
 0x3b7   :  { %v2290_v42 = vsel %vm4373_vm2, %v2256_v8, %v4204_v16  ;;  %v940_v8 = vand.u32 4, %v4014_v43 }
 0x3b8   :  { %2253 = vrot.lane.b32.xlu1 %v4463_v23, %s3279_s5 }
 0x3b9   :  { %vm956_vm13 = vcmp.ne.s32.totalorder %v940_v8, 0 }
 0x3ba   :  { %v2070_v38 = vpop.permute.xlu1 %2069 }
 0x3bb   :  { %v4474_v55 = vsel %vm4407_vm5, %v2070_v38, %v3783_v7 }
 0x3bc   :  { %2335 = vrot.lane.b32.xlu1 %v2290_v42, %s3280_s6 }
 0x3be   :  { %v2152_v12 = vpop.permute.xlu1 %2151 }
 0x3bf   :  { %v4485_v16 = vsel %vm4426_vm6, %v2152_v12, %v4215_v4  ;;  %v986_v4 = vpop.permute.xlu0 %985  ;;  %vm2634_vm6 = vcmask 1040384  }
 0x3c0   :  { %2149 = vrot.lane.b32.xlu1 %v4474_v55, %s3278_s30  ;;  %v1030_v30 = vsel %vm4501_vm8, %v986_v4, %v4199_v56  ;;  %v937_v56 = vand.u32 4, %v3981_v26 }
 0x3c2   :  { %v2244_v59 = vpop.permute.xlu1 %2243  ;;  %vm4531_vm11 = vcmp.ne.s32.totalorder %v937_v56, 0  ;;  %v933_v56 = vand.u32 4, %v4143_v34 }
 0x3c3   :  { %v2284_v17 = vsel %vm4394_vm4, %v2244_v59, %v4222_v47  ;;  %v941_v59 = vand.u32 4, %v4020_v46 }
 0x3c4   :  { %2323 = vrot.lane.b32.xlu1 %v2284_v17, %s3280_s6  ;;  %vm4615_vm2 = vcmp.ne.s32.totalorder %v933_v56, 0 }
 0x3c5   :  { %vm957_vm14 = vcmp.ne.s32.totalorder %v941_v59, 0 }
 0x3c6   :  { %v2154_v40 = vpop.permute.xlu1 %2153 }
 0x3c7   :  { %v4492_v37 = vsel %vm4445_vm7, %v2154_v40, %v4229_v60  ;;  %v823_v60 = vand.u32 2, %v4249_v6 }
 0x3c8   :  { %2231 = vrot.lane.b32.xlu1 %v4485_v16, %s3279_s5 }
 0x3c9   :  { %vm4510_vm9 = vcmp.ne.s32.totalorder %v823_v60, 0 }
 0x3ca   :  { %v2236_v7 = vpop.permute.xlu1 %2235 }
 0x3cb   :  { %v2280_v26 = vsel %vm4501_vm8, %v2236_v7, %v4236_v5  ;;  %v827_v5 = vand.u32 2, %v4278_v25 }
 0x3cc   :  { %2233 = vrot.lane.b32.xlu1 %v4492_v37, %s3279_s5 }
 0x3cd   :  { %vm843_vm12 = vcmp.ne.s32.totalorder %v827_v5, 0 }
 0x3ce   :  { %v2258_v47 = vpop.permute.xlu1 %2257 }
 0x3cf   :  { %v2291_v28 = vsel %vm4390_vm3, %v2258_v47, %v4243_v36  ;;  %v943_v47 = vand.u32 4, %v4049_v61 }
 0x3d0   :  { %2417 = vrot.lane.b32.xlu1 %v2291_v28, %s3281_s7 }
 0x3d1   :  { %vm959_vm15 = vcmp.ne.s32.totalorder %v943_v47, 0 }
 0x3d9   :  { %v1122_v0 = vpop.permute.xlu0 %1121 }
 0x3da   :  { %1233 = vrot.lane.b32.xlu0 %v1122_v0, %s3281_s7 }
 0x3dd   :  { %v876_v44 = vpop.permute.xlu0 %875 }
 0x3de   :  { %1097 = vrot.lane.b32.xlu0 %v1030_v30, %s3280_s6  ;;  %v4519_v58 = vsel %vm4510_vm9, %v876_v44, %v4268_v48 }
 0x3e1   :  { %v990_v29 = vpop.permute.xlu0 %989 }
 0x3e2   :  { %987 = vrot.lane.b32.xlu0 %v4519_v58, %s3279_s5  ;;  %v1032_v1 = vsel %vm4521_vm10, %v990_v29, %v4283_v24 }
 0x3e5   :  { %v992_v48 = vpop.permute.xlu0 %991 }
 0x3e6   :  { %1101 = vrot.lane.b32.xlu0 %v1032_v1, %s3280_s6  ;;  %v1033_v35 = vsel %vm4531_vm11, %v992_v48, %v4295_v49  ;;  %v935_v48 = vand.u32 4, %v4249_v6 }
 0x3e8   :  { %vm4625_vm3 = vcmp.ne.s32.totalorder %v935_v48, 0 }
 0x3e9   :  { %v884_v45 = vpop.permute.xlu0 %883 }
 0x3ea   :  { %1215 = vrot.lane.b32.xlu0 %v1033_v35, %s3281_s7 }
 0x3ed   :  { %v2166_v2 = vpop.permute.xlu0 %2165 }
 0x3ee   :  { %v4567_v42 = vsel %vm843_vm12, %v2166_v2, %v4306_v52 }
 0x3f1   :  { %v998_v18 = vpop.permute.xlu0 %997 }
 0x3f2   :  { %v1036_v43 = vsel %vm956_vm13, %v998_v18, %v4318_v62 }
 0x3f5   :  { %v1000_v38 = vpop.permute.xlu0 %999 }
 0x3f6   :  { %v1037_v46 = vsel %vm957_vm14, %v1000_v38, %v4329_v27 }
 0x40a   :  { %v2340_v14 = vpop.permute.xlu1 %2339 }
 0x40b   :  { %2419 = vrot.lane.b32.xlu1 %v2340_v14, %s3281_s7 }
 0x40e   :  { %v2158_v24 = vpop.permute.xlu1 %2157 }
 0x40f   :  { %2315 = vrot.lane.b32.xlu1 %v2280_v26, %s3280_s6  ;;  %v4548_v54 = vsel %vm4510_vm9, %v2158_v24, %v4349_v32 }
 0x412   :  { %v2240_v49 = vpop.permute.xlu1 %2239 }
 0x413   :  { %2237 = vrot.lane.b32.xlu1 %v4548_v54, %s3279_s5  ;;  %v2282_v39 = vsel %vm4521_vm10, %v2240_v49, %v4367_v15  ;;  %v4564_v15 = vsel %vm843_vm12, %v884_v45, %v4300_v11  ;;  %v939_v49 = vand.u32 4, %v4278_v25 }
 0x415   :  { %vm955_vm4 = vcmp.ne.s32.totalorder %v939_v49, 0 }
 0x416   :  { %v2242_v13 = vpop.permute.xlu1 %2241 }
 0x417   :  { %2319 = vrot.lane.b32.xlu1 %v2282_v39, %s3280_s6  ;;  %v2283_v51 = vsel %vm4531_vm11, %v2242_v13, %v4385_v20  ;;  %v1114_v20 = vpop.permute.xlu0 %1113 }
 0x41a   :  { %v1106_v32 = vpop.permute.xlu1 %1105 }
 0x41b   :  { %2401 = vrot.lane.b32.xlu1 %v2283_v51, %s3281_s7  ;;  %1217 = vrot.lane.b32.xlu0 %v1106_v32, %s3281_s7  ;;  %v1004_v52 = vpop.permute.xlu0 %1003 }
 0x41c   :  { %v1039_v28 = vsel %vm959_vm15, %v1004_v52, %v4362_v33 }
 0x41e   :  { %v2248_v12 = vpop.permute.xlu1 %2247 }
 0x41f   :  { %2245 = vrot.lane.b32.xlu1 %v4567_v42, %s3279_s5  ;;  %995 = vrot.lane.b32.xlu0 %v4564_v15, %s3279_s5  ;;  %v2286_v17 = vsel %vm956_vm13, %v2248_v12, %v4420_v3  ;;  %v1118_v3 = vpop.permute.xlu0 %1117 }
 0x422   :  { %v2250_v11 = vpop.permute.xlu1 %2249 }
 0x423   :  { %1109 = vrot.lane.b32.xlu0 %v1036_v43, %s3280_s6  ;;  %2327 = vrot.lane.b32.xlu1 %v2286_v17, %s3280_s6  ;;  %v2287_v40 = vsel %vm957_vm14, %v2250_v11, %v4439_v57  ;;  %v1232_v61 = vpop.permute.xlu0 %1231 }
 0x426   :  { %v2332_v7 = vpop.permute.xlu1 %2331 }
 0x427   :  { %1223 = vrot.lane.b32.xlu0 %v1037_v46, %s3281_s7  ;;  %2409 = vrot.lane.b32.xlu1 %v2287_v40, %s3281_s7  ;;  %v868_v50 = vpop.permute.xlu0 %867 }
 0x428   :  { %v4594_v33 = vsel %vm835_vm0, %v868_v50, %v4415_v31  ;;  %v932_v31 = vand.u32 4, %v4125_v21 }
 0x42a   :  { %v2254_v62 = vpop.permute.xlu1 %2253  ;;  %vm4606_vm1 = vcmp.ne.s32.totalorder %v932_v31, 0 }
 0x42b   :  { %1225 = vrot.lane.b32.xlu0 %v1114_v20, %s3281_s7  ;;  %2411 = vrot.lane.b32.xlu1 %v2332_v7, %s3281_s7  ;;  %v2289_v27 = vsel %vm959_vm15, %v2254_v62, %v4463_v23  ;;  %v982_v44 = vpop.permute.xlu0 %981 }
 0x42e   :  { %v2336_v4 = vpop.permute.xlu1 %2335 }
 0x42f   :  { %1339 = vrot.lane.b32.xlu0 %v1039_v28, %s3282_s8  ;;  %2493 = vrot.lane.b32.xlu1 %v2289_v27, %s3282_s8  ;;  %v984_v53 = vpop.permute.xlu0 %983 }
 0x430   :  { %v1029_v9 = vsel %vm4615_vm2, %v984_v53, %v4452_v63 }
 0x432   :  { %v2150_v57 = vpop.permute.xlu1 %2149 }
 0x433   :  { %1341 = vrot.lane.b32.xlu0 %v1118_v3, %s3282_s8  ;;  %v4600_v60 = vsel %vm835_vm0, %v2150_v57, %v4474_v55  ;;  %v1028_v55 = vsel %vm4606_vm1, %v982_v44, %v4434_v41 }
 0x436   :  { %v2324_v0 = vpop.permute.xlu1 %2323 }
 0x437   :  { %1343 = vrot.lane.b32.xlu0 %v1232_v61, %s3282_s8  ;;  %2403 = vrot.lane.b32.xlu1 %v2324_v0, %s3281_s7 }
 0x43a   :  { %v2232_v23 = vpop.permute.xlu1 %2231 }
 0x43b   :  { %979 = vrot.lane.b32.xlu0 %v4594_v33, %s3279_s5  ;;  %2495 = vrot.lane.b32.xlu1 %v2336_v4, %s3282_s8  ;;  %v2278_v14 = vsel %vm4606_vm1, %v2232_v23, %v4485_v16 }
 0x43e   :  { %v2234_v30 = vpop.permute.xlu1 %2233 }
 0x43f   :  { %2229 = vrot.lane.b32.xlu1 %v4600_v60, %s3279_s5 }
 0x442   :  { %v2418_v36 = vpop.permute.xlu1 %2417 }
 0x443   :  { %2497 = vrot.lane.b32.xlu1 %v2418_v36, %s3282_s8 }
 0x44c   :  { %v1234_v29 = vpop.permute.xlu0 %1233 }
 0x44d   :  { %1345 = vrot.lane.b32.xlu0 %v1234_v29, %s3282_s8  ;;  %v931_v29 = vand.u32 4, %v3825_v22 }
 0x44f   :  { %vm947_vm5 = vcmp.ne.s32.totalorder %v931_v29, 0 }
 0x450   :  { %v1098_v21 = vpop.permute.xlu0 %1097 }
 0x451   :  { %1093 = vrot.lane.b32.xlu0 %v1028_v55, %s3280_s6 }
 0x454   :  { %v988_v34 = vpop.permute.xlu0 %987 }
 0x455   :  { %1207 = vrot.lane.b32.xlu0 %v1029_v9, %s3281_s7  ;;  %v1031_v41 = vsel %vm4625_vm3, %v988_v34, %v4519_v58  ;;  %v2279_v58 = vsel %vm4615_vm2, %v2234_v30, %v4492_v37 }
 0x458   :  { %v1102_v45 = vpop.permute.xlu0 %1101 }
 0x459   :  { %1209 = vrot.lane.b32.xlu0 %v1098_v21, %s3281_s7 }
 0x45c   :  { %v1216_v63 = vpop.permute.xlu0 %1215 }
 0x45d   :  { %1323 = vrot.lane.b32.xlu0 %v1031_v41, %s3282_s8 }
 0x461   :  { %1325 = vrot.lane.b32.xlu0 %v1102_v45, %s3282_s8 }
 0x465   :  { %1327 = vrot.lane.b32.xlu0 %v1216_v63, %s3282_s8 }
 0x47d   :  { %v2420_v6 = vpop.permute.xlu1 %2419 }
 0x47e   :  { %2499 = vrot.lane.b32.xlu1 %v2420_v6, %s3282_s8 }
 0x481   :  { %v2316_v26 = vpop.permute.xlu1 %2315 }
 0x482   :  { %2311 = vrot.lane.b32.xlu1 %v2278_v14, %s3280_s6 }
 0x485   :  { %v2238_v24 = vpop.permute.xlu1 %2237 }
 0x486   :  { %2393 = vrot.lane.b32.xlu1 %v2279_v58, %s3281_s7  ;;  %v2281_v18 = vsel %vm4625_vm3, %v2238_v24, %v4548_v54 }
 0x489   :  { %v2320_v2 = vpop.permute.xlu1 %2319 }
 0x48a   :  { %2395 = vrot.lane.b32.xlu1 %v2316_v26, %s3281_s7 }
 0x48d   :  { %v1218_v16 = vpop.permute.xlu0 %1217  ;;  %v2402_v39 = vpop.permute.xlu1 %2401 }
 0x48e   :  { %1329 = vrot.lane.b32.xlu0 %v1218_v16, %s3282_s8  ;;  %2477 = vrot.lane.b32.xlu1 %v2281_v18, %s3282_s8 }
 0x491   :  { %v996_v37 = vpop.permute.xlu0 %995  ;;  %v2246_v13 = vpop.permute.xlu1 %2245 }
 0x492   :  { %v1035_v5 = vsel %vm955_vm4, %v996_v37, %v4564_v15  ;;  %2479 = vrot.lane.b32.xlu1 %v2320_v2, %s3282_s8  ;;  %v2285_v54 = vsel %vm955_vm4, %v2246_v13, %v4567_v42 }
 0x493   :  { %1443 = vrot.lane.b32.xlu0 %v1035_v5, %s3283_s1 }
 0x495   :  { %v1110_v25 = vpop.permute.xlu0 %1109  ;;  %v2328_v51 = vpop.permute.xlu1 %2327 }
 0x496   :  { %2481 = vrot.lane.b32.xlu1 %v2402_v39, %s3282_s8 }
 0x497   :  { %1445 = vrot.lane.b32.xlu0 %v1110_v25, %s3283_s1 }
 0x499   :  { %v1224_v32 = vpop.permute.xlu0 %1223  ;;  %v2410_v8 = vpop.permute.xlu1 %2409 }
 0x49a   :  { %2565 = vrot.lane.b32.xlu1 %v2285_v54, %s3283_s1 }
 0x49b   :  { %1447 = vrot.lane.b32.xlu0 %v1224_v32, %s3283_s1 }
 0x49d   :  { %v1226_v38 = vpop.permute.xlu0 %1225  ;;  %v2412_v15 = vpop.permute.xlu1 %2411 }
 0x49e   :  { %2567 = vrot.lane.b32.xlu1 %v2328_v51, %s3283_s1 }
 0x49f   :  { %1449 = vrot.lane.b32.xlu0 %v1226_v38, %s3283_s1 }
 0x4a1   :  { %v1340_v12 = vpop.permute.xlu0 %1339  ;;  %v2494_v59 = vpop.permute.xlu1 %2493 }
 0x4a2   :  { %2569 = vrot.lane.b32.xlu1 %v2410_v8, %s3283_s1 }
 0x4a3   :  { %1451 = vrot.lane.b32.xlu0 %v1340_v12, %s3283_s1 }
 0x4a5   :  { %v1342_v20 = vpop.permute.xlu0 %1341 }
 0x4a6   :  { %2571 = vrot.lane.b32.xlu1 %v2412_v15, %s3283_s1 }
 0x4a7   :  { %1453 = vrot.lane.b32.xlu0 %v1342_v20, %s3283_s1 }
 0x4a9   :  { %v1344_v42 = vpop.permute.xlu0 %1343  ;;  %v2404_v43 = vpop.permute.xlu1 %2403 }
 0x4aa   :  { %2483 = vrot.lane.b32.xlu1 %v2404_v43, %s3282_s8 }
 0x4ab   :  { %1455 = vrot.lane.b32.xlu0 %v1344_v42, %s3283_s1 }
 0x4ad   :  { %v2496_v17 = vpop.permute.xlu1 %2495  ;;  %v980_v46 = vpop.permute.xlu0 %979 }
 0x4ae   :  { %2573 = vrot.lane.b32.xlu1 %v2494_v59, %s3283_s1  ;;  %v1027_v21 = vsel %vm947_vm5, %v980_v46, %v4594_v33 }
 0x4b1   :  { %v2230_v11 = vpop.permute.xlu1 %2229 }
 0x4b2   :  { %2575 = vrot.lane.b32.xlu1 %v2496_v17, %s3283_s1  ;;  %v2277_v56 = vsel %vm947_vm5, %v2230_v11, %v4600_v60 }
 0x4b5   :  { %v2498_v52 = vpop.permute.xlu1 %2497 }
 0x4b6   :  { %2577 = vrot.lane.b32.xlu1 %v2498_v52, %s3283_s1 }
 0x4bf   :  { %v1346_v40 = vpop.permute.xlu0 %1345 }
 0x4c0   :  { %1457 = vrot.lane.b32.xlu0 %v1346_v40, %s3283_s1 }
 0x4c3   :  { %v1094_v47 = vpop.permute.xlu0 %1093 }
 0x4c4   :  { %v1491_v9 = vadd.f32 %v1094_v47, %v1027_v21 }
 0x4c7   :  { %v1208_v3 = vpop.permute.xlu0 %1207 }
 0x4c8   :  { %v1492_v35 = vadd.f32 %v1491_v9, %v1208_v3 }
 0x4cb   :  { %v1210_v27 = vpop.permute.xlu0 %1209 }
 0x4cc   :  { %v1493_v63 = vadd.f32 %v1492_v35, %v1210_v27 }
 0x4cf   :  { %v1324_v61 = vpop.permute.xlu0 %1323 }
 0x4d0   :  { %v1494_v14 = vadd.f32 %v1493_v63, %v1324_v61 }
 0x4d3   :  { %v1326_v19 = vpop.permute.xlu0 %1325 }
 0x4d4   :  { %v1495_v22 = vadd.f32 %v1494_v14, %v1326_v19 }
 0x4d7   :  { %v1328_v50 = vpop.permute.xlu0 %1327 }
 0x4d8   :  { %v1496_v49 = vadd.f32 %v1495_v22, %v1328_v50 }
 0x4f0   :  { %v2500_v7 = vpop.permute.xlu1 %2499 }
 0x4f1   :  { %2579 = vrot.lane.b32.xlu1 %v2500_v7, %s3283_s1 }
 0x4f4   :  { %v2312_v62 = vpop.permute.xlu1 %2311 }
 0x4f5   :  { %v2613_v1 = vadd.f32 %v2312_v62, %v2277_v56 }
 0x4f8   :  { %v2394_v28 = vpop.permute.xlu1 %2393 }
 0x4f9   :  { %v2614_v48 = vadd.f32 %v2613_v1, %v2394_v28 }
 0x4fc   :  { %v2396_v4 = vpop.permute.xlu1 %2395 }
 0x4fd   :  { %v2615_v41 = vadd.f32 %v2614_v48, %v2396_v4 }
 0x500   :  { %v2478_v57 = vpop.permute.xlu1 %2477  ;;  %v1330_v30 = vpop.permute.xlu0 %1329 }
 0x501   :  { %v2616_v6 = vadd.f32 %v2615_v41, %v2478_v57  ;;  %v1497_v18 = vadd.f32 %v1496_v49, %v1330_v30 }
 0x504   :  { %v2480_v0 = vpop.permute.xlu1 %2479 }
 0x505   :  { %v1444_v36 = vpop.permute.xlu0 %1443  ;;  %v2617_v26 = vadd.f32 %v2616_v6, %v2480_v0 }
 0x506   :  { %v1498_v16 = vadd.f32 %v1497_v18, %v1444_v36 }
 0x508   :  { %v2482_v23 = vpop.permute.xlu1 %2481 }
 0x509   :  { %v1446_v31 = vpop.permute.xlu0 %1445  ;;  %v2618_v24 = vadd.f32 %v2617_v26, %v2482_v23 }
 0x50a   :  { %v1499_v37 = vadd.f32 %v1498_v16, %v1446_v31 }
 0x50c   :  { %v2566_v44 = vpop.permute.xlu1 %2565 }
 0x50d   :  { %v1448_v55 = vpop.permute.xlu0 %1447 }
 0x50e   :  { %v1500_v13 = vadd.f32 %v1499_v37, %v1448_v55 }
 0x510   :  { %v2568_v53 = vpop.permute.xlu1 %2567 }
 0x511   :  { %v1450_v45 = vpop.permute.xlu0 %1449 }
 0x512   :  { %v1501_v25 = vadd.f32 %v1500_v13, %v1450_v45 }
 0x514   :  { %v2570_v10 = vpop.permute.xlu1 %2569 }
 0x515   :  { %v1452_v2 = vpop.permute.xlu0 %1451 }
 0x516   :  { %v1502_v54 = vadd.f32 %v1501_v25, %v1452_v2 }
 0x518   :  { %v2572_v34 = vpop.permute.xlu1 %2571 }
 0x519   :  { %v1454_v33 = vpop.permute.xlu0 %1453 }
 0x51a   :  { %v1503_v38 = vadd.f32 %v1502_v54, %v1454_v33 }
 0x51c   :  { %v2484_v58 = vpop.permute.xlu1 %2483 }
 0x51d   :  { %v2619_v60 = vadd.f32 %v2618_v24, %v2484_v58  ;;  %v1456_v51 = vpop.permute.xlu0 %1455 }
 0x51e   :  { %v1504_v12 = vadd.f32 %v1503_v38, %v1456_v51 }
 0x51f   :  { %v2620_v39 = vadd.f32 %v2619_v60, %v2566_v44 }
 0x520   :  { %v2574_v8 = vpop.permute.xlu1 %2573 }
 0x521   :  { %v2621_v5 = vadd.f32 %v2620_v39, %v2568_v53 }
 0x523   :  { %v2622_v32 = vadd.f32 %v2621_v5, %v2570_v10 }
 0x524   :  { %v2576_v42 = vpop.permute.xlu1 %2575 }
 0x525   :  { %v2623_v59 = vadd.f32 %v2622_v32, %v2572_v34 }
 0x527   :  { %v2624_v43 = vadd.f32 %v2623_v59, %v2574_v8 }
 0x528   :  { %v2578_v52 = vpop.permute.xlu1 %2577 }
 0x529   :  { %v2625_v11 = vadd.f32 %v2624_v43, %v2576_v42 }
 0x52b   :  { %v2626_v40 = vadd.f32 %v2625_v11, %v2578_v52 }
 0x532   :  { %v1458_v15 = vpop.permute.xlu0 %1457 }
 0x533   :  { %v1505_v20 = vadd.f32 %v1504_v12, %v1458_v15 }
 0x535   :  { %v1506_v17 = vrot.slane %v1505_v20, 4 }
 0x537   :  { %v1507_v46 = vadd.f32 %v1506_v17, %v1505_v20 }
 0x539   :  { %v1508_v47 = vrot.slane %v1507_v46, 2 }
 0x53b   :  { %v1509_v28 = vadd.f32 %v1508_v47, %v1507_v46 }
 0x53d   :  { %v1510_v61 = vrot.slane %v1509_v28, 1 }
 0x53f   :  { %v1511_v0 = vadd.f32 %v1510_v61, %v1509_v28 }
 0x563   :  { %v2580_v7 = vpop.permute.xlu1 %2579 }
 0x564   :  { %v2627_v62 = vadd.f32 %v2626_v40, %v2580_v7 }
 0x566   :  { %v2628_v3 = vrot.slane %v2627_v62, 4 }
 0x568   :  { %v2629_v27 = vadd.f32 %v2628_v3, %v2627_v62 }
 0x56a   :  { %v2630_v4 = vrot.slane %v2629_v27, 2 }
 0x56c   :  { %v2631_v57 = vadd.f32 %v2630_v4, %v2629_v27 }
 0x56e   :  { %v2632_v19 = vrot.slane %v2631_v57, 1 }
 0x570   :  { %v2633_v50 = vadd.f32 %v2632_v19, %v2631_v57 }
 0x572   :  { %v2635_v23 = vsel %vm2634_vm6, %v1511_v0, %v2633_v50 }
 0x573   :  { %2636 = vst [vmem:[#allocation2] sm:$0x3] %v2635_v23 }
 0x574   :  { %3264 = shalt.err (!%p3261_p4)
}
 0x575   :  { %s3265_s14 = scalar_lea.hbm %s4692_s4, 32 }
 0x576   :  { %p3266_p5 = scmp.ne.s32.totalorder %s4692_s4, %s3265_s14  ;;  %p3269_p6 = scmp.lt.u32.totalorder %s3265_s14, %s4692_s4 }
 0x578   :  { %p3271_p7 = pnand %p3269_p6, %p3266_p5 }
 0x57a   :  { %3274 = shalt.err (!%p3271_p7)
}
 0x57b   :  { %2646 = dma.vmem_to_hbm [thread:$0]  %s2644_s10, 32, %s4692_s4, [#allocation3]  }
 0x57c   :  { %3275 = dma.done.wait [#allocation3], 32  }
 0x57d   :  { %3276 = vsyncadd [#allocation3], 4294967264 }
 0x57e   :  { %2650 = vsyncpa [#allocation3], 1 }

</bundles_post_ra>
